<compile_context>
chip_gen: v6e
topology: v6e:2x2x1
jax: 0.10.0
libtpu: 0.0.40
codegen_flags: <defaults>
</compile_context>

<pallas_src>
import math

import jax
import jax.numpy as jnp
from jax.experimental import pallas as pl

# ---------------- small config (mirrors MLPConfig fields) -------------------
NUM_REWARD_BINS = 32     # config.num_reward_bins
NUM_STATE_DIMS = 256     # config.num_state_dims (84*84*4 in the original; small here)
NUM_ACTIONS = 18         # config.num_actions
INTERMEDIATE_DIM = 128   # config.intermediate_dim
REWARD_WEIGHT = 1.0      # config.reward_weight
BATCH = 16

H = INTERMEDIATE_DIM
H3 = 3 * H               # fused hidden width (main | action | reward)


def _gelu_exact(x):
    # torch.nn.GELU() default = exact (erf-based) GELU; erf runs on the VPU
    # which is otherwise idle between the three MXU matmuls at this size.
    return 0.5 * x * (1.0 + jax.lax.erf(x * (1.0 / math.sqrt(2.0))))


# --------------------------- fused RvS kernel --------------------------------
def _rvs_fused_kernel(r_ref, s_ref, emb_ref, w0_ref, b0_ref, w1_ref, b1_ref,
                      w2_ref, b2_ref, binned_ref, out_ref):
    # ---- Binner ------------------------------------------------------------
    # TODO(synk): torch mutates a persistent running_min_max buffer and
    # returns int64 bins; here min/max are batch-local (same [0,1] init) and
    # bins are int32.
    r = r_ref[...]                                            # (B, 1) f32
    mn = jnp.minimum(jnp.float32(0.0), jnp.min(r))
    mx = jnp.maximum(jnp.float32(1.0), jnp.max(r))
    binned = jnp.floor(
        (r - mn) / (mx - mn + 1e-4) * NUM_REWARD_BINS).astype(jnp.int32)
    binned_ref[...] = binned                                  # (B, 1) i32

    # ---- reward-embedding lookup as a one-hot MXU matmul --------------------
    bins = jax.lax.broadcasted_iota(
        jnp.int32, (binned.shape[0], NUM_REWARD_BINS), 1)     # (B, 32)
    onehot = (binned == bins).astype(jnp.float32)             # (B, 32)
    # emb table is zero-padded to 384 cols, so only the main head gets the add.
    emb = jnp.dot(onehot, emb_ref[...],
                  preferred_element_type=jnp.float32) * REWARD_WEIGHT   # (B, 384)

    # ---- three fused MLP heads: Linear -> GELU -> Linear -> GELU -> Linear --
    h0 = jnp.dot(s_ref[...], w0_ref[...], preferred_element_type=jnp.float32)
    h0 = h0 + b0_ref[...] + emb                               # (B, 384)
    g0 = _gelu_exact(h0)
    h1 = jnp.dot(g0, w1_ref[...], preferred_element_type=jnp.float32) + b1_ref[...]
    g1 = _gelu_exact(h1)
    out = jnp.dot(g1, w2_ref[...], preferred_element_type=jnp.float32) + b2_ref[...]
    out_ref[...] = out                                        # (B, 384) lane-dense


def rvs_forward(params, r, s):
    f = params["fused"]
    B = s.shape[0]
    binned, slab = pl.pallas_call(
        _rvs_fused_kernel,
        out_shape=(
            jax.ShapeDtypeStruct((B, 1), jnp.int32),
            jax.ShapeDtypeStruct((B, H3), jnp.float32),
        ),
    )(r.reshape(B, 1).astype(jnp.float32), s,
      f["emb"], f["w0"], f["b0"], f["w1"], f["b1"], f["w2"], f["b2"])
    # Slice the lane-dense slab back into the three heads (plain JAX glue).
    a_pred_cond = slab[:, 0:NUM_ACTIONS]
    a_pred_uncond = slab[:, H:H + NUM_ACTIONS]
    r_pred_uncond = slab[:, 2 * H:2 * H + NUM_REWARD_BINS]
    return binned.reshape(B), a_pred_cond, a_pred_uncond, r_pred_uncond


# ----------------------------- parameters ------------------------------------
def _init_linear(key, din, dout):
    kw, kb = jax.random.split(key)
    lim = 1.0 / math.sqrt(din)
    w = jax.random.uniform(kw, (din, dout), jnp.float32, -lim, lim)   # (in, out)
    b = jax.random.uniform(kb, (1, dout), jnp.float32, -lim, lim)
    return w, b


def _init_mlp(key, din, dh, dout):
    k0, k1, k2 = jax.random.split(key, 3)
    return (_init_linear(k0, din, dh),     # state_embed
            _init_linear(k1, dh, dh),      # hidden layer 0
            _init_linear(k2, dh, dout))    # hidden layer 1 (head)


def _pad_cols(x, n):
    return jnp.pad(x, ((0, 0), (0, n - x.shape[1])))


def _block_diag3(a, b, c):
    """Pack three (H, <=H) blocks into a (3H, 3H) block-diagonal matrix."""
    a, b, c = _pad_cols(a, H), _pad_cols(b, H), _pad_cols(c, H)
    z = jnp.zeros((H, H), jnp.float32)
    top = jnp.concatenate([a, z, z], axis=1)
    mid = jnp.concatenate([z, b, z], axis=1)
    bot = jnp.concatenate([z, z, c], axis=1)
    return jnp.concatenate([top, mid, bot], axis=0)


def _fuse_heads(reward_embed, main, action, reward):
    (m0, mb0), (m1, mb1), (m2, mb2) = main
    (a0, ab0), (a1, ab1), (a2, ab2) = action
    (r0, rb0), (r1, rb1), (r2, rb2) = reward
    return {
        "emb": _pad_cols(reward_embed, H3),                       # (32, 384)
        "w0": jnp.concatenate([m0, a0, r0], axis=1),              # (256, 384)
        "b0": jnp.concatenate([mb0, ab0, rb0], axis=1),           # (1, 384)
        "w1": _block_diag3(m1, a1, r1),                           # (384, 384)
        "b1": jnp.concatenate([mb1, ab1, rb1], axis=1),           # (1, 384)
        "w2": _block_diag3(m2, a2, r2),                           # (384, 384)
        "b2": jnp.concatenate(
            [_pad_cols(mb2, H), _pad_cols(ab2, H), _pad_cols(rb2, H)], axis=1),
    }


def init_params(key):
    k_emb, k_main, k_act, k_rew = jax.random.split(key, 4)
    reward_embed = jax.random.normal(
        k_emb, (NUM_REWARD_BINS, INTERMEDIATE_DIM), jnp.float32)
    main = _init_mlp(k_main, NUM_STATE_DIMS, INTERMEDIATE_DIM, NUM_ACTIONS)
    action = _init_mlp(k_act, NUM_STATE_DIMS, INTERMEDIATE_DIM, NUM_ACTIONS)
    reward = _init_mlp(k_rew, NUM_STATE_DIMS, INTERMEDIATE_DIM, NUM_REWARD_BINS)
    return {
        "reward_embed": reward_embed,
        "main": main,
        "action": action,
        "reward": reward,
        # weight packing done once at init time (not on the forward path)
        "fused": _fuse_heads(reward_embed, main, action, reward),
    }


# ------------------------------ pure-JAX ref ----------------------------------
def _ref_mlp(s, add, layers):
    (w0, b0), (w1, b1), (w2, b2) = layers
    h = s @ w0 + b0 + add
    h = _gelu_exact(h) @ w1 + b1
    return _gelu_exact(h) @ w2 + b2


def ref_forward(params, r, s):
    mn = jnp.minimum(0.0, jnp.min(r))
    mx = jnp.maximum(1.0, jnp.max(r))
    binned = jnp.floor((r - mn) / (mx - mn + 1e-4) * NUM_REWARD_BINS).astype(jnp.int32)
    emb = params["reward_embed"][binned] * REWARD_WEIGHT
    zero = jnp.zeros((s.shape[0], INTERMEDIATE_DIM), jnp.float32)
    return (binned,
            _ref_mlp(s, emb, params["main"]),
            _ref_mlp(s, zero, params["action"]),
            _ref_mlp(s, zero, params["reward"]))


if __name__ == "__main__":
    key = jax.random.PRNGKey(0)
    kr, ks, kp = jax.random.split(key, 3)
    r = jax.random.uniform(kr, (BATCH,), jnp.float32, minval=-2.0, maxval=3.0)
    s = jax.random.normal(ks, (BATCH, NUM_STATE_DIMS), jnp.float32)
    params = init_params(kp)

    outs = rvs_forward(params, r, s)
    outs = jax.block_until_ready(outs)

    ref = ref_forward(params, r, s)
    assert bool(jnp.all(outs[0] == ref[0])), "binned reward mismatch"
    for got, want in zip(outs[1:], ref[1:]):
        assert jnp.allclose(got, want, rtol=1e-2, atol=1e-2), "MLP output mismatch"

    print("KERNEL_OK")
</pallas_src>

<mosaic_0001>
module attributes {stable_mosaic.version = 11 : i64} {
  func.func @_rvs_fused_kernel(%arg0: memref<16x1xf32, #tpu.memory_space<vmem>>, %arg1: memref<16x256xf32, #tpu.memory_space<vmem>>, %arg2: memref<32x384xf32, #tpu.memory_space<vmem>>, %arg3: memref<256x384xf32, #tpu.memory_space<vmem>>, %arg4: memref<1x384xf32, #tpu.memory_space<vmem>>, %arg5: memref<384x384xf32, #tpu.memory_space<vmem>>, %arg6: memref<1x384xf32, #tpu.memory_space<vmem>>, %arg7: memref<384x384xf32, #tpu.memory_space<vmem>>, %arg8: memref<1x384xf32, #tpu.memory_space<vmem>>, %arg9: memref<16x1xi32, #tpu.memory_space<vmem>>, %arg10: memref<16x384xf32, #tpu.memory_space<vmem>>) attributes {dimension_semantics = [], scalar_prefetch = 0 : i64, scratch_operands = 0 : i64, tpu.core_type = #tpu.core_type<tc>} {
    %c0 = arith.constant 0 : index
    %c0_0 = arith.constant 0 : index
    %0 = vector.load %arg0[%c0, %c0_0] : memref<16x1xf32, #tpu.memory_space<vmem>>, vector<16x1xf32>
    %1 = vector.shape_cast %0 : vector<16x1xf32> to vector<1x16x1xf32>
    %cst = arith.constant dense<0x7F800000> : vector<1xf32>
    %2 = vector.multi_reduction <minimumf>, %1, %cst [1, 2] : vector<1x16x1xf32> to vector<1xf32>
    %3 = vector.shape_cast %2 : vector<1xf32> to vector<1x1x1xf32>
    %4 = vector.extract %3[0, 0, 0] : f32 from vector<1x1x1xf32>
    %cst_1 = arith.constant 0.000000e+00 : f32
    %5 = arith.minimumf %cst_1, %4 : f32
    %6 = vector.shape_cast %0 : vector<16x1xf32> to vector<1x16x1xf32>
    %cst_2 = arith.constant dense<0xFF800000> : vector<1xf32>
    %7 = vector.multi_reduction <maximumf>, %6, %cst_2 [1, 2] : vector<1x16x1xf32> to vector<1xf32>
    %8 = vector.shape_cast %7 : vector<1xf32> to vector<1x1x1xf32>
    %9 = vector.extract %8[0, 0, 0] : f32 from vector<1x1x1xf32>
    %cst_3 = arith.constant 1.000000e+00 : f32
    %10 = arith.maximumf %cst_3, %9 : f32
    %11 = vector.broadcast %5 : f32 to vector<16x1xf32>
    %12 = arith.subf %0, %11 : vector<16x1xf32>
    %13 = arith.subf %10, %5 : f32
    %cst_4 = arith.constant 9.99999974E-5 : f32
    %14 = arith.addf %13, %cst_4 : f32
    %15 = vector.broadcast %14 : f32 to vector<16x1xf32>
    %16 = arith.divf %12, %15 : vector<16x1xf32>
    %cst_5 = arith.constant 3.200000e+01 : f32
    %17 = vector.broadcast %cst_5 : f32 to vector<16x1xf32>
    %18 = arith.mulf %16, %17 : vector<16x1xf32>
    %19 = math.floor %18 : vector<16x1xf32>
    %20 = arith.fptosi %19 : vector<16x1xf32> to vector<16x1xi32>
    %c0_6 = arith.constant 0 : index
    %c0_7 = arith.constant 0 : index
    %21 = vector.load %arg9[%c0_6, %c0_7] : memref<16x1xi32, #tpu.memory_space<vmem>>, vector<16x1xi32>
    tpu.vector_store %arg9[%c0_6, %c0_7], %20 {strides = array<i32>} : memref<16x1xi32, #tpu.memory_space<vmem>>, vector<16x1xi32>,
    %22 = tpu.iota {dimensions = array<i32: 1>} : vector<16x32xi32>
    %23 = vector.broadcast %20 : vector<16x1xi32> to vector<16x32xi32>
    %24 = arith.cmpi eq, %23, %22 : vector<16x32xi32>
    %25 = arith.extui %24 : vector<16x32xi1> to vector<16x32xi32>
    %26 = arith.sitofp %25 : vector<16x32xi32> to vector<16x32xf32>
    %c0_8 = arith.constant 0 : index
    %c0_9 = arith.constant 0 : index
    %27 = vector.load %arg2[%c0_8, %c0_9] : memref<32x384xf32, #tpu.memory_space<vmem>>, vector<32x384xf32>
    %cst_10 = arith.constant dense<0.000000e+00> : vector<16x384xf32>
    %28 = tpu.matmul %26, %27, %cst_10 {dimension_numbers = #tpu.dot_dimension_numbers<[1], [0], [0], [1], [0, 0, 1, 1], [], []>} : vector<16x32xf32>, vector<32x384xf32>, vector<16x384xf32> -> vector<16x384xf32>
    %cst_11 = arith.constant 1.000000e+00 : f32
    %29 = vector.broadcast %cst_11 : f32 to vector<16x384xf32>
    %30 = arith.mulf %28, %29 : vector<16x384xf32>
    %c0_12 = arith.constant 0 : index
    %c0_13 = arith.constant 0 : index
    %31 = vector.load %arg1[%c0_12, %c0_13] : memref<16x256xf32, #tpu.memory_space<vmem>>, vector<16x256xf32>
    %c0_14 = arith.constant 0 : index
    %c0_15 = arith.constant 0 : index
    %32 = vector.load %arg3[%c0_14, %c0_15] : memref<256x384xf32, #tpu.memory_space<vmem>>, vector<256x384xf32>
    %cst_16 = arith.constant dense<0.000000e+00> : vector<16x384xf32>
    %33 = tpu.matmul %31, %32, %cst_16 {dimension_numbers = #tpu.dot_dimension_numbers<[1], [0], [0], [1], [0, 0, 1, 1], [], []>} : vector<16x256xf32>, vector<256x384xf32>, vector<16x384xf32> -> vector<16x384xf32>
    %c0_17 = arith.constant 0 : index
    %c0_18 = arith.constant 0 : index
    %34 = vector.load %arg4[%c0_17, %c0_18] : memref<1x384xf32, #tpu.memory_space<vmem>>, vector<1x384xf32>
    %35 = vector.broadcast %34 : vector<1x384xf32> to vector<16x384xf32>
    %36 = arith.addf %33, %35 : vector<16x384xf32>
    %37 = arith.addf %36, %30 : vector<16x384xf32>
    %cst_19 = arith.constant 5.000000e-01 : f32
    %38 = vector.broadcast %cst_19 : f32 to vector<16x384xf32>
    %39 = arith.mulf %38, %37 : vector<16x384xf32>
    %cst_20 = arith.constant 0.707106769 : f32
    %40 = vector.broadcast %cst_20 : f32 to vector<16x384xf32>
    %41 = arith.mulf %37, %40 : vector<16x384xf32>
    %42 = math.erf %41 : vector<16x384xf32>
    %cst_21 = arith.constant 1.000000e+00 : f32
    %43 = vector.broadcast %cst_21 : f32 to vector<16x384xf32>
    %44 = arith.addf %43, %42 : vector<16x384xf32>
    %45 = arith.mulf %39, %44 : vector<16x384xf32>
    %c0_22 = arith.constant 0 : index
    %c0_23 = arith.constant 0 : index
    %46 = vector.load %arg5[%c0_22, %c0_23] : memref<384x384xf32, #tpu.memory_space<vmem>>, vector<384x384xf32>
    %cst_24 = arith.constant dense<0.000000e+00> : vector<16x384xf32>
    %47 = tpu.matmul %45, %46, %cst_24 {dimension_numbers = #tpu.dot_dimension_numbers<[1], [0], [0], [1], [0, 0, 1, 1], [], []>} : vector<16x384xf32>, vector<384x384xf32>, vector<16x384xf32> -> vector<16x384xf32>
    %c0_25 = arith.constant 0 : index
    %c0_26 = arith.constant 0 : index
    %48 = vector.load %arg6[%c0_25, %c0_26] : memref<1x384xf32, #tpu.memory_space<vmem>>, vector<1x384xf32>
    %49 = vector.broadcast %48 : vector<1x384xf32> to vector<16x384xf32>
    %50 = arith.addf %47, %49 : vector<16x384xf32>
    %cst_27 = arith.constant 5.000000e-01 : f32
    %51 = vector.broadcast %cst_27 : f32 to vector<16x384xf32>
    %52 = arith.mulf %51, %50 : vector<16x384xf32>
    %cst_28 = arith.constant 0.707106769 : f32
    %53 = vector.broadcast %cst_28 : f32 to vector<16x384xf32>
    %54 = arith.mulf %50, %53 : vector<16x384xf32>
    %55 = math.erf %54 : vector<16x384xf32>
    %cst_29 = arith.constant 1.000000e+00 : f32
    %56 = vector.broadcast %cst_29 : f32 to vector<16x384xf32>
    %57 = arith.addf %56, %55 : vector<16x384xf32>
    %58 = arith.mulf %52, %57 : vector<16x384xf32>
    %c0_30 = arith.constant 0 : index
    %c0_31 = arith.constant 0 : index
    %59 = vector.load %arg7[%c0_30, %c0_31] : memref<384x384xf32, #tpu.memory_space<vmem>>, vector<384x384xf32>
    %cst_32 = arith.constant dense<0.000000e+00> : vector<16x384xf32>
    %60 = tpu.matmul %58, %59, %cst_32 {dimension_numbers = #tpu.dot_dimension_numbers<[1], [0], [0], [1], [0, 0, 1, 1], [], []>} : vector<16x384xf32>, vector<384x384xf32>, vector<16x384xf32> -> vector<16x384xf32>
    %c0_33 = arith.constant 0 : index
    %c0_34 = arith.constant 0 : index
    %61 = vector.load %arg8[%c0_33, %c0_34] : memref<1x384xf32, #tpu.memory_space<vmem>>, vector<1x384xf32>
    %62 = vector.broadcast %61 : vector<1x384xf32> to vector<16x384xf32>
    %63 = arith.addf %60, %62 : vector<16x384xf32>
    %c0_35 = arith.constant 0 : index
    %c0_36 = arith.constant 0 : index
    %64 = vector.load %arg10[%c0_35, %c0_36] : memref<16x384xf32, #tpu.memory_space<vmem>>, vector<16x384xf32>
    tpu.vector_store %arg10[%c0_35, %c0_36], %63 {strides = array<i32>} : memref<16x384xf32, #tpu.memory_space<vmem>>, vector<16x384xf32>,
    return
  }
}

</mosaic_0001>

<bundles_post_ra>
// kernel: tpu_custom_call.1
= control target key start
LH: loop header
LB: loop body
LE: loop exit
PB: predicated region body
PF: predicated region fallthrough
CT: control target
= control target key end

     0   :  { %16 = vsyncpa [#allocation3], 0  ;;  %s2283_s0 = inlined_call_operand.vmem [shape: f32[16,1], index: 0, kind: input, shape index: {}]   ;;  %s2284_s1 = inlined_call_operand.hbm [shape: f32[16,256], index: 1, kind: input, shape index: {}]   ;;  %s2285_s2 = inlined_call_operand.hbm [shape: f32[32,384], index: 2, kind: input, shape index: {}]   ;;  %s2286_s3 = inlined_call_operand.hbm [shape: f32[256,384], index: 3, kind: input, shape index: {}]   ;;  %s2287_s4 = inlined_call_operand.vmem [shape: f32[1,384], index: 4, kind: input, shape index: {}]   ;;  %s2288_s5 = inlined_call_operand.hbm [shape: f32[384,384], index: 5, kind: input, shape index: {}]   ;;  %s2289_s6 = inlined_call_operand.vmem [shape: f32[1,384], index: 6, kind: input, shape index: {}]   ;;  %s2290_s7 = inlined_call_operand.hbm [shape: f32[384,384], index: 7, kind: input, shape index: {}]   ;;  %s2291_s8 = inlined_call_operand.vmem [shape: f32[1,384], index: 8, kind: input, shape index: {}]   ;;  %s2292_s9 = inlined_call_operand.vmem [shape: s32[16,1], index: 9, kind: output, shape index: {0}]   ;;  %s2293_s10 = inlined_call_operand.hbm [shape: f32[16,384], index: 10, kind: output, shape index: {1}]  }
   0x1   :  { %17 = vsyncpa [#allocation6], 0 }
   0x2   :  { %18 = vsyncpa [#allocation9], 0 }
   0x3   :  { %19 = vsyncpa [#allocation4], 0  ;;  %s2049_s13 = smov [#allocation5]  }
   0x4   :  { %s39_s14 = sshll.u32 %s2049_s13, 4  ;;  %s40_s14 = int_to_ptr.vmem [resolvable:$true] %s39_s14 }
   0x5   :  { %s1929_s15 = scalar_lea.vmem %s40_s14, 1536  ;;  %p1934_p1 = scmp.lt.s32.totalorder %s40_s14, %s40_s14 }
   0x6   :  { %p1930_p0 = scmp.ne.s32.totalorder %s40_s14, %s1929_s15  ;;  %p1935_p2 = scmp.lt.s32.totalorder %s1929_s15, %s1929_s15 }
   0x8   :  { %p1936_p3 = por %p1935_p2, %p1934_p1 }
   0xa   :  { %p1937_p4 = pnand %p1936_p3, %p1930_p0 }
   0xc   :  { %1940 = shalt.err (!%p1937_p4)
}
   0xd   :  { %s2050_s16 = smov 384   ;;  %s2051_s17 = smov 24  }
   0xe   :  { %45 = dma.hbm_to_vmem [thread:$0]  %s2285_s2, 1536, %s40_s14, [#allocation6], %s2050_s16, %s2050_s16, %s2051_s17  }
   0xf   :  { %s2052_s20 = smov [#allocation8]   ;;  %s2053_s22 = smov [#allocation2]  }
  0x10   :  { %s65_s21 = sshll.u32 %s2052_s20, 4  ;;  %s27_s23 = sshll.u32 %s2053_s22, 4  ;;  %s66_s21 = int_to_ptr.vmem [resolvable:$true] %s65_s21  ;;  %s28_s23 = int_to_ptr.vmem [resolvable:$true] %s27_s23 }
  0x11   :  { %s1949_s24 = scalar_lea.vmem %s66_s21, 18432  ;;  %p1954_p6 = scmp.lt.s32.totalorder %s66_s21, %s66_s21 }
  0x12   :  { %p1950_p5 = scmp.ne.s32.totalorder %s66_s21, %s1949_s24  ;;  %p1955_p7 = scmp.lt.s32.totalorder %s1949_s24, %s1949_s24 }
  0x14   :  { %p1956_p8 = por %p1955_p7, %p1954_p6 }
  0x16   :  { %p1957_p9 = pnand %p1956_p8, %p1950_p5 }
  0x18   :  { %1960 = shalt.err (!%p1957_p9)
}
  0x19   :  { %71 = dma.hbm_to_vmem [thread:$0]  %s2288_s5, 18432, %s66_s21, [#allocation9], %s2050_s16, %s2050_s16, %s2051_s17  }
  0x1a   :  { %s1969_s2 = scalar_lea.vmem %s28_s23, 512  ;;  %p1974_p11 = scmp.lt.s32.totalorder %s28_s23, %s28_s23 }
  0x1b   :  { %p1970_p10 = scmp.ne.s32.totalorder %s28_s23, %s1969_s2  ;;  %p1975_p12 = scmp.lt.s32.totalorder %s1969_s2, %s1969_s2 }
  0x1d   :  { %p1976_p13 = por %p1975_p12, %p1974_p11 }
  0x1f   :  { %p1977_p0 = pnand %p1976_p13, %p1970_p10 }
  0x21   :  { %1980 = shalt.err (!%p1977_p0)
}
  0x22   :  { %s2054_s27 = smov 256   ;;  %s2055_s28 = smov 16  }
  0x23   :  { %33 = dma.hbm_to_vmem [thread:$0]  %s2284_s1, 512, %s28_s23, [#allocation3], %s2054_s27, %s2054_s27, %s2055_s28  }
  0x24   :  { %s2056_s11 = smov [#allocation7]   ;;  %s2057_s13 = smov [#allocation10]  }
  0x25   :  { %s51_s12 = sshll.u32 %s2056_s11, 4  ;;  %s79_s14 = sshll.u32 %s2057_s13, 4  ;;  %s52_s12 = int_to_ptr.vmem [resolvable:$true] %s51_s12  ;;  %s80_s14 = int_to_ptr.vmem [resolvable:$true] %s79_s14 }
  0x26   :  { %s1989_s5 = scalar_lea.vmem %s52_s12, 12288  ;;  %p1994_p2 = scmp.lt.s32.totalorder %s52_s12, %s52_s12 }
  0x27   :  { %p1990_p1 = scmp.ne.s32.totalorder %s52_s12, %s1989_s5  ;;  %p1995_p3 = scmp.lt.s32.totalorder %s1989_s5, %s1989_s5 }
  0x29   :  { %p1996_p4 = por %p1995_p3, %p1994_p2 }
  0x2b   :  { %p1997_p5 = pnand %p1996_p4, %p1990_p1 }
  0x2d   :  { %2000 = shalt.err (!%p1997_p5)
}
  0x2e   :  { %57 = dma.hbm_to_vmem [thread:$0]  %s2286_s3, 12288, %s52_s12, [#allocation6], %s2050_s16, %s2050_s16, %s2051_s17  }
  0x2f   :  { %s2009_s1 = scalar_lea.vmem %s80_s14, 18432  ;;  %p2014_p7 = scmp.lt.s32.totalorder %s80_s14, %s80_s14 }
  0x30   :  { %p2010_p6 = scmp.ne.s32.totalorder %s80_s14, %s2009_s1  ;;  %p2015_p8 = scmp.lt.s32.totalorder %s2009_s1, %s2009_s1 }
  0x32   :  { %p2016_p9 = por %p2015_p8, %p2014_p7 }
  0x34   :  { %p2017_p10 = pnand %p2016_p9, %p2010_p6 }
  0x36   :  { %2020 = shalt.err (!%p2017_p10)
}
  0x37   :  { %85 = dma.hbm_to_vmem [thread:$0]  %s2290_s7, 18432, %s80_s14, [#allocation9], %s2050_s16, %s2050_s16, %s2051_s17  }
  0x38   :  { %2041 = dma.done.wait [#allocation3], 512  }
  0x39   :  { %2042 = vsyncadd [#allocation3], 4294966784 }
  0x3a   :  { %2043 = dma.done.wait [#allocation6], 13824  }
  0x3b   :  { %2044 = vsyncadd [#allocation6], 4294953472 }
  0x3c   :  { %2045 = dma.done.wait [#allocation9], 36864  }
  0x3d   :  { %2046 = vsyncadd [#allocation9], 4294930432  ;;  %vm105_vm0 = vcmask 7168   ;;  %v2148_v0 = vld [vmem:[%s2283_s0] sm:$0xff]  ;;  %v2153_v1 = vld [vmem:[%s2283_s0 + $0x8] sm:$0xff]  ;;  %v2058_v8 = vmov 0  }
  0x3e   :  { %v106_v2 = vsel %vm105_vm0, %v2148_v0, inf  ;;  %v107_v3 = vsel %vm105_vm0, %v2153_v1, inf  ;;  %v119_v4 = vsel %vm105_vm0, %v2148_v0, -inf  ;;  %v120_v5 = vsel %vm105_vm0, %v2153_v1, -inf  ;;  %1893 = vset.pattern.permute.xlu1 %v2058_v8  ;;  %1894 = vset.pattern.permute.xlu0 %v2058_v8  ;;  %v384_v9 = vld [vmem:[#allocation7 + $0x170] sm:$0xff]  ;;  %v383_v10 = vld [vmem:[#allocation7 + $0x168] sm:$0xff] }
  0x3f   :  { %v108_v6 = vmin.f32 %v106_v2, %v107_v3  ;;  %v121_v7 = vmax.f32 %v119_v4, %v120_v5  ;;  %v381_v11 = vld [vmem:[#allocation7 + $0x158] sm:$0xff]  ;;  %451 = vmatprep.subr.mxu0 %v384_v9  ;;  %v380_v12 = vld [vmem:[#allocation7 + $0x150] sm:$0xff]  ;;  %v2059_v13 = vmov 0.0   ;;  %v378_v14 = vld [vmem:[#allocation7 + $0x140] sm:$0xff]  ;;  %s2060_s24 = smov 0.0   ;;  %s2061_s26 = smov 1.0  }
  0x40   :  { %246 = vmatprep.mubr.f32.mxu1 %v2059_v13  ;;  %452 = vmatpush1.msra.mxu0 %v383_v10  ;;  %v377_v15 = vld [vmem:[#allocation7 + $0x138] sm:$0xff]  ;;  %v375_v16 = vld [vmem:[#allocation7 + $0x128] sm:$0xff]  ;;  %v374_v17 = vld [vmem:[#allocation7 + $0x120] sm:$0xff]  ;;  %vm175_vm1 = vcmask 261120  }
  0x41   :  { %109 = vmin.xlane.f32.xlu0 %v108_v6  ;;  %453 = vmatprep.subr.mxu0 %v381_v11  ;;  %v372_v18 = vld [vmem:[#allocation7 + $0x110] sm:$0xff]  ;;  %v371_v19 = vld [vmem:[#allocation7 + $0x108] sm:$0xff]  ;;  %v369_v20 = vld [vmem:[#allocation7 + $0xf8] sm:$0xff] }
  0x42   :  { %454 = vmatpush1.msra.mxu0 %v380_v12  ;;  %v368_v21 = vld [vmem:[#allocation7 + $0xf0] sm:$0xff]  ;;  %v366_v22 = vld [vmem:[#allocation7 + $0xe0] sm:$0xff]  ;;  %v365_v23 = vld [vmem:[#allocation7 + $0xd8] sm:$0xff] }
  0x43   :  { %455 = vmatprep.subr.mxu0 %v378_v14  ;;  %v363_v24 = vld [vmem:[#allocation7 + $0xc8] sm:$0xff]  ;;  %v362_v25 = vld [vmem:[#allocation7 + $0xc0] sm:$0xff]  ;;  %v360_v26 = vld [vmem:[#allocation7 + $0xb0] sm:$0xff] }
  0x44   :  { %456 = vmatpush1.msra.mxu0 %v377_v15  ;;  %v359_v27 = vld [vmem:[#allocation7 + $0xa8] sm:$0xff]  ;;  %v357_v28 = vld [vmem:[#allocation7 + $0x98] sm:$0xff]  ;;  %v356_v29 = vld [vmem:[#allocation7 + $0x90] sm:$0xff] }
  0x45   :  { %122 = vmax.xlane.f32.xlu0 %v121_v7  ;;  %457 = vmatprep.subr.mxu0 %v375_v16  ;;  %v354_v30 = vld [vmem:[#allocation7 + $0x80] sm:$0xff]  ;;  %v353_v31 = vld [vmem:[#allocation7 + $0x78] sm:$0xff]  ;;  %v173_v32 = vld [vmem:[#allocation5 + $0x50] sm:$0xff] }
  0x46   :  { %458 = vmatpush1.msra.mxu0 %v374_v17  ;;  %v172_v33 = vld [vmem:[#allocation5 + $0x48] sm:$0xff]  ;;  %206 = vmatprep.subr.mxu1 %v173_v32  ;;  %v170_v35 = vld [vmem:[#allocation5 + $0x38] sm:$0xff]  ;;  %v350_v36 = vld [vmem:[#allocation7 + $0x60] sm:$0xff] }
  0x47   :  { %459 = vmatprep.subr.mxu0 %v372_v18  ;;  %v351_v34 = vld [vmem:[#allocation7 + $0x68] sm:$0xff]  ;;  %207 = vmatpush1.msra.mxu1 %v172_v33  ;;  %v169_v37 = vld [vmem:[#allocation5 + $0x30] sm:$0xff]  ;;  %v167_v38 = vld [vmem:[#allocation5 + $0x20] sm:$0xff] }
  0x48   :  { %460 = vmatpush1.msra.mxu0 %v371_v19  ;;  %v348_v39 = vld [vmem:[#allocation7 + $0x50] sm:$0xff]  ;;  %208 = vmatprep.subr.mxu1 %v170_v35  ;;  %v166_v40 = vld [vmem:[#allocation5 + $0x18] sm:$0xff]  ;;  %v347_v41 = vld [vmem:[#allocation7 + $0x48] sm:$0xff] }
  0x49   :  { %461 = vmatprep.subr.mxu0 %v369_v20  ;;  %209 = vmatpush1.msra.mxu1 %v169_v37  ;;  %v164_v42 = vld [vmem:[#allocation5 + $0x8] sm:$0xff]  ;;  %v345_v43 = vld [vmem:[#allocation7 + $0x38] sm:$0xff]  ;;  %v344_v45 = vld [vmem:[#allocation7 + $0x30] sm:$0xff] }
  0x4a   :  { %462 = vmatpush1.msra.mxu0 %v368_v21  ;;  %210 = vmatprep.subr.mxu1 %v167_v38  ;;  %v2164_v44 = vld [vmem:[#allocation2 + $0x8] sm:$0xff]  ;;  %v342_v46 = vld [vmem:[#allocation7 + $0x20] sm:$0xff]  ;;  %v341_v48 = vld [vmem:[#allocation7 + $0x18] sm:$0xff] }
  0x4b   :  { %463 = vmatprep.subr.mxu0 %v366_v22  ;;  %211 = vmatpush1.msra.mxu1 %v166_v40  ;;  %v339_v50 = vld [vmem:[#allocation7 + $0x8] sm:$0xff]  ;;  %v338_v51 = vld [vmem:[#allocation7] sm:$0xff]  ;;  %v432_v53 = vld [vmem:[#allocation7 + $0x2f0] sm:$0xff] }
  0x4c   :  { %464 = vmatpush1.msra.mxu0 %v365_v23  ;;  %212 = vmatprep.subr.mxu1 %v164_v42  ;;  %v431_v55 = vld [vmem:[#allocation7 + $0x2e8] sm:$0xff]  ;;  %v429_v58 = vld [vmem:[#allocation7 + $0x2d8] sm:$0xff]  ;;  %v428_v59 = vld [vmem:[#allocation7 + $0x2d0] sm:$0xff] }
  0x4d   :  { %465 = vmatprep.subr.mxu0 %v363_v24  ;;  %515 = vmatprep.mubr.f32.mxu0 %v2164_v44  ;;  %v426_v62 = vld [vmem:[#allocation7 + $0x2c0] sm:$0xff]  ;;  %v425_v63 = vld [vmem:[#allocation7 + $0x2b8] sm:$0xff]  ;;  %v423_v4 = vld [vmem:[#allocation7 + $0x2a8] sm:$0xff] }
  0x4e   :  { %466 = vmatpush1.msra.mxu0 %v362_v25  ;;  %v422_v5 = vld [vmem:[#allocation7 + $0x2a0] sm:$0xff]  ;;  %v420_v8 = vld [vmem:[#allocation7 + $0x290] sm:$0xff]  ;;  %v419_v9 = vld [vmem:[#allocation7 + $0x288] sm:$0xff] }
  0x4f   :  { %467 = vmatprep.subr.mxu0 %v360_v26  ;;  %v417_v11 = vld [vmem:[#allocation7 + $0x278] sm:$0xff]  ;;  %v416_v12 = vld [vmem:[#allocation7 + $0x270] sm:$0xff]  ;;  %v414_v15 = vld [vmem:[#allocation7 + $0x260] sm:$0xff] }
  0x50   :  { %468 = vmatpush1.msra.mxu0 %v359_v27  ;;  %v413_v16 = vld [vmem:[#allocation7 + $0x258] sm:$0xff]  ;;  %v411_v17 = vld [vmem:[#allocation7 + $0x248] sm:$0xff]  ;;  %v410_v18 = vld [vmem:[#allocation7 + $0x240] sm:$0xff] }
  0x51   :  { %469 = vmatprep.subr.mxu0 %v357_v28  ;;  %v408_v19 = vld [vmem:[#allocation7 + $0x230] sm:$0xff]  ;;  %v407_v20 = vld [vmem:[#allocation7 + $0x228] sm:$0xff]  ;;  %v405_v21 = vld [vmem:[#allocation7 + $0x218] sm:$0xff] }
  0x52   :  { %470 = vmatpush1.msra.mxu0 %v356_v29  ;;  %v404_v22 = vld [vmem:[#allocation7 + $0x210] sm:$0xff]  ;;  %v402_v23 = vld [vmem:[#allocation7 + $0x200] sm:$0xff]  ;;  %v401_v24 = vld [vmem:[#allocation7 + $0x1f8] sm:$0xff] }
  0x53   :  { %471 = vmatprep.subr.mxu0 %v354_v30  ;;  %v399_v25 = vld [vmem:[#allocation7 + $0x1e8] sm:$0xff]  ;;  %v398_v26 = vld [vmem:[#allocation7 + $0x1e0] sm:$0xff]  ;;  %v396_v27 = vld [vmem:[#allocation7 + $0x1d0] sm:$0xff] }
  0x54   :  { %472 = vmatpush1.msra.mxu0 %v353_v31  ;;  %v395_v28 = vld [vmem:[#allocation7 + $0x1c8] sm:$0xff]  ;;  %v393_v29 = vld [vmem:[#allocation7 + $0x1b8] sm:$0xff]  ;;  %v392_v30 = vld [vmem:[#allocation7 + $0x1b0] sm:$0xff] }
  0x55   :  { %473 = vmatprep.subr.mxu0 %v351_v34  ;;  %v390_v31 = vld [vmem:[#allocation7 + $0x1a0] sm:$0xff]  ;;  %v389_v32 = vld [vmem:[#allocation7 + $0x198] sm:$0xff]  ;;  %v387_v33 = vld [vmem:[#allocation7 + $0x188] sm:$0xff] }
  0x56   :  { %474 = vmatpush1.msra.mxu0 %v350_v36  ;;  %v386_v34 = vld [vmem:[#allocation7 + $0x180] sm:$0xff] }
  0x57   :  { %475 = vmatprep.subr.mxu0 %v348_v39 }
  0x58   :  { %476 = vmatpush1.msra.mxu0 %v347_v41 }
  0x59   :  { %477 = vmatprep.subr.mxu0 %v345_v43 }
  0x5a   :  { %478 = vmatpush1.msra.mxu0 %v344_v45 }
  0x5b   :  { %479 = vmatprep.subr.mxu0 %v342_v46 }
  0x5c   :  { %480 = vmatpush1.msra.mxu0 %v341_v48  ;;  %v2169_v48 = vld [vmem:[#allocation2] sm:$0xff] }
  0x5d   :  { %481 = vmatprep.subr.mxu0 %v339_v50 }
  0x5e   :  { %482 = vmatpush1.msra.mxu0 %v338_v51  ;;  %v174_v51 = vld [vmem:[#allocation5 + $0x58] sm:$0xff] }
  0x5f   :  { %483 = vmatprep.subr.mxu0 %v432_v53  ;;  %v2183_v53 = vld [vmem:[#allocation2 + $0x10] sm:$0xff] }
  0x60   :  { %484 = vmatpush2.msra.mxu0 %v431_v55 }
  0x61   :  { %485 = vmatprep.subr.mxu0 %v429_v58  ;;  %v171_v58 = vld [vmem:[#allocation5 + $0x40] sm:$0xff] }
  0x62   :  { %486 = vmatpush2.msra.mxu0 %v428_v59 }
  0x63   :  { %487 = vmatprep.subr.mxu0 %v426_v62  ;;  %v165_v62 = vld [vmem:[#allocation5 + $0x10] sm:$0xff] }
  0x64   :  { %488 = vmatpush2.msra.mxu0 %v425_v63  ;;  %v433_v63 = vld [vmem:[#allocation7 + $0x2f8] sm:$0xff] }
  0x65   :  { %489 = vmatprep.subr.mxu0 %v423_v4  ;;  %v382_v4 = vld [vmem:[#allocation7 + $0x160] sm:$0xff] }
  0x66   :  { %490 = vmatpush2.msra.mxu0 %v422_v5  ;;  %v427_v5 = vld [vmem:[#allocation7 + $0x2c8] sm:$0xff] }
  0x67   :  { %491 = vmatprep.subr.mxu0 %v420_v8  ;;  %v376_v8 = vld [vmem:[#allocation7 + $0x130] sm:$0xff] }
  0x68   :  { %492 = vmatpush2.msra.mxu0 %v419_v9  ;;  %v421_v9 = vld [vmem:[#allocation7 + $0x298] sm:$0xff] }
  0x69   :  { %493 = vmatprep.subr.mxu0 %v417_v11  ;;  %v418_v11 = vld [vmem:[#allocation7 + $0x280] sm:$0xff] }
  0x6a   :  { %494 = vmatpush2.msra.mxu0 %v416_v12  ;;  %v370_v12 = vld [vmem:[#allocation7 + $0x100] sm:$0xff] }
  0x6b   :  { %495 = vmatprep.subr.mxu0 %v414_v15  ;;  %v367_v15 = vld [vmem:[#allocation7 + $0xe8] sm:$0xff] }
  0x6c   :  { %496 = vmatpush2.msra.mxu0 %v413_v16  ;;  %v364_v16 = vld [vmem:[#allocation7 + $0xd0] sm:$0xff] }
  0x6d   :  { %497 = vmatprep.subr.mxu0 %v411_v17  ;;  %v409_v17 = vld [vmem:[#allocation7 + $0x238] sm:$0xff] }
  0x6e   :  { %498 = vmatpush2.msra.mxu0 %v410_v18  ;;  %v361_v18 = vld [vmem:[#allocation7 + $0xb8] sm:$0xff] }
  0x6f   :  { %499 = vmatprep.subr.mxu0 %v408_v19  ;;  %v406_v19 = vld [vmem:[#allocation7 + $0x220] sm:$0xff] }
  0x70   :  { %500 = vmatpush2.msra.mxu0 %v407_v20  ;;  %v358_v20 = vld [vmem:[#allocation7 + $0xa0] sm:$0xff] }
  0x71   :  { %501 = vmatprep.subr.mxu0 %v405_v21  ;;  %v403_v21 = vld [vmem:[#allocation7 + $0x208] sm:$0xff] }
  0x72   :  { %502 = vmatpush2.msra.mxu0 %v404_v22  ;;  %v355_v22 = vld [vmem:[#allocation7 + $0x88] sm:$0xff] }
  0x73   :  { %503 = vmatprep.subr.mxu0 %v402_v23  ;;  %v400_v23 = vld [vmem:[#allocation7 + $0x1f0] sm:$0xff] }
  0x74   :  { %504 = vmatpush2.msra.mxu0 %v401_v24  ;;  %v352_v24 = vld [vmem:[#allocation7 + $0x70] sm:$0xff] }
  0x75   :  { %505 = vmatprep.subr.mxu0 %v399_v25  ;;  %v397_v25 = vld [vmem:[#allocation7 + $0x1d8] sm:$0xff] }
  0x76   :  { %506 = vmatpush2.msra.mxu0 %v398_v26  ;;  %v349_v26 = vld [vmem:[#allocation7 + $0x58] sm:$0xff] }
  0x77   :  { %507 = vmatprep.subr.mxu0 %v396_v27  ;;  %v394_v27 = vld [vmem:[#allocation7 + $0x1c0] sm:$0xff] }
  0x78   :  { %508 = vmatpush2.msra.mxu0 %v395_v28  ;;  %v346_v28 = vld [vmem:[#allocation7 + $0x40] sm:$0xff] }
  0x79   :  { %509 = vmatprep.subr.mxu0 %v393_v29  ;;  %v391_v29 = vld [vmem:[#allocation7 + $0x1a8] sm:$0xff] }
  0x7a   :  { %510 = vmatpush2.msra.mxu0 %v392_v30  ;;  %v343_v30 = vld [vmem:[#allocation7 + $0x28] sm:$0xff] }
  0x7b   :  { %511 = vmatprep.subr.mxu0 %v390_v31  ;;  %v388_v31 = vld [vmem:[#allocation7 + $0x190] sm:$0xff] }
  0x7c   :  { %512 = vmatpush2.msra.mxu0 %v389_v32  ;;  %v340_v32 = vld [vmem:[#allocation7 + $0x10] sm:$0xff] }
  0x7d   :  { %513 = vmatprep.subr.mxu0 %v387_v33  ;;  %v685_v33 = vld [vmem:[#allocation8 + $0x170] sm:$0xff] }
  0x7e   :  { %514 = vmatpush2.msra.mxu0 %v386_v34  ;;  %v684_v34 = vld [vmem:[#allocation8 + $0x168] sm:$0xff] }
  0x7f   :  { %516 = vmatmul.mubr.f32.vlgmr.msra.gmra.mxu0 %v2169_v48 }
  0xca   :  { %v110_v47 = vpop.xlane.xlu0 %109 }
  0xcb   :  { %v111_v49 = vrot.slane %v110_v47, 4 }
  0xcd   :  { %v112_v52 = vmin.f32 %v110_v47, %v111_v49  ;;  %v163_v47 = vld [vmem:[#allocation5] sm:$0xff] }
  0xce   :  { %v123_v54 = vpop.xlane.xlu0 %122  ;;  %213 = vmatpush1.msra.mxu1 %v163_v47  ;;  %v666_v47 = vld [vmem:[#allocation8 + $0xd8] sm:$0xff] }
  0xcf   :  { %v113_v56 = vrot.slane %v112_v52, 2  ;;  %v124_v57 = vrot.slane %v123_v54, 4  ;;  %1790 = vmatprep.subr.mxu1 %v174_v51 }
  0xd1   :  { %v125_v60 = vmax.f32 %v123_v54, %v124_v57  ;;  %v114_v61 = vmin.f32 %v112_v52, %v113_v56  ;;  %v149_v54 = vlaneseq }
  0xd3   :  { %v126_v2 = vrot.slane %v125_v60, 2  ;;  %v115_v3 = vrot.slane %v114_v61, 1  ;;  %v150_v55 = vand.u32 127, %v149_v54 }
  0xd5   :  { %v127_v6 = vmax.f32 %v125_v60, %v126_v2  ;;  %v116_v7 = vmin.f32 %v114_v61, %v115_v3  ;;  %v168_v60 = vld [vmem:[#allocation5 + $0x28] sm:$0xff]  ;;  %v385_v2 = vld [vmem:[#allocation7 + $0x178] sm:$0xff]  ;;  %v430_v3 = vld [vmem:[#allocation7 + $0x2e0] sm:$0xff] }
  0xd7   :  { %1871 = vpush %v116_v7  ;;  %v128_v10 = vrot.slane %v127_v6, 1  ;;  %v424_v7 = vld [vmem:[#allocation7 + $0x2b0] sm:$0xff] }
  0xd9   :  { %v129_v14 = vmax.f32 %v127_v6, %v128_v10  ;;  %v379_v6 = vld [vmem:[#allocation7 + $0x148] sm:$0xff]  ;;  %v373_v10 = vld [vmem:[#allocation7 + $0x118] sm:$0xff] }
  0xdb   :  { %1873 = vpush %v129_v14  ;;  %v415_v14 = vld [vmem:[#allocation7 + $0x268] sm:$0xff] }
 0x108   :  { %s1872_s0 = spop %1871 }
 0x109   :  { %s118_s25 = smin.f32 %s2060_s24, %s1872_s0 }
 0x10a   :  { %v132_v36 = vstv %s118_s25 }
 0x10b   :  { %v133_v37 = vsub.f32 %v2148_v0, %v132_v36  ;;  %v134_v38 = vsub.f32 %v2153_v1, %v132_v36  ;;  %v2172_v1 = vld [vmem:[#allocation2 + $0x18] sm:$0xff]  ;;  %v681_v36 = vld [vmem:[#allocation8 + $0x150] sm:$0xff] }
 0x10c   :  { %s1874_s7 = spop %1873  ;;  %521 = vmatprep.mubr.f32.mxu0 %v2172_v1 }
 0x10d   :  { %s131_s2 = smax.f32 %s2061_s26, %s1874_s7  ;;  %522 = vmatmul.mubr.f32.gmra.mxu0 %v2183_v53 }
 0x10e   :  { %s135_s27 = ssub.f32 %s131_s2, %s118_s25  ;;  %941 = vmatprep.mubr.f32.mxu0 %v2059_v13 }
 0x110   :  { %s136_s28 = sadd.f32 0.0001, %s135_s27 }
 0x112   :  { %v137_v35 = vstv %s136_s28 }
 0x113   :  { %1895 = vrcp.f32 %v137_v35  ;;  %v682_v35 = vld [vmem:[#allocation8 + $0x158] sm:$0xff] }
 0x120   :  { %v1896_v39 = vpop.eup %1895 }
 0x121   :  { %v139_v40 = vmul.f32 %v1896_v39, %v133_v37  ;;  %v140_v41 = vmul.f32 %v1896_v39, %v134_v38  ;;  %v679_v37 = vld [vmem:[#allocation8 + $0x140] sm:$0xff]  ;;  %v678_v38 = vld [vmem:[#allocation8 + $0x138] sm:$0xff]  ;;  %v676_v39 = vld [vmem:[#allocation8 + $0x128] sm:$0xff] }
 0x123   :  { %v141_v42 = vmul.f32 32.0, %v139_v40  ;;  %v142_v43 = vmul.f32 32.0, %v140_v41  ;;  %v675_v40 = vld [vmem:[#allocation8 + $0x120] sm:$0xff]  ;;  %v673_v41 = vld [vmem:[#allocation8 + $0x110] sm:$0xff] }
 0x125   :  { %v143_v45 = vfloor.f32 %v141_v42  ;;  %v144_v46 = vfloor.f32 %v142_v43  ;;  %v672_v42 = vld [vmem:[#allocation8 + $0x108] sm:$0xff]  ;;  %v670_v43 = vld [vmem:[#allocation8 + $0xf8] sm:$0xff] }
 0x127   :  { %v1875_v49 = vtrunc.f32 %v143_v45  ;;  %v1877_v50 = vtrunc.f32 %v144_v46  ;;  %v669_v45 = vld [vmem:[#allocation8 + $0xf0] sm:$0xff]  ;;  %v667_v46 = vld [vmem:[#allocation8 + $0xe0] sm:$0xff] }
 0x129   :  { %v1876_v0 = vcvt.f32.s32 %v1875_v49  ;;  %v1878_v52 = vcvt.f32.s32 %v1877_v50  ;;  %v663_v49 = vld [vmem:[#allocation8 + $0xc0] sm:$0xff]  ;;  %v661_v50 = vld [vmem:[#allocation8 + $0xb0] sm:$0xff] }
 0x12b   :  { %152 = vperm.xlu1 %1893, %v1876_v0   ;;  %147 = vst.msk [vmem:[%s2292_s9] sm:$0xff] %vm105_vm0, %v1876_v0  ;;  %148 = vst.msk [vmem:[%s2292_s9 + $0x8] sm:$0xff] %vm105_vm0, %v1878_v52  ;;  %v658_v0 = vld [vmem:[#allocation8 + $0x98] sm:$0xff] }
 0x12f   :  { %155 = vperm.xlu1 %1893, %v1878_v52   ;;  %v657_v52 = vld [vmem:[#allocation8 + $0x90] sm:$0xff] }
 0x1a6   :  { %v153_v56 = vpop.permute.xlu1 %152 }
 0x1a7   :  { %vm157_vm2 = vcmp.eq.s32.totalorder %v153_v56, %v150_v55  ;;  %v651_v56 = vld [vmem:[#allocation8 + $0x60] sm:$0xff] }
 0x1a8   :  { %v1628_v57 = vsel %vm157_vm2, 1.0, %v2059_v13 }
 0x1a9   :  { %1630 = vmatmul.mubr.msk.f32.vlgmr.msra.gmra.mxu1 %vm175_vm1, %v1628_v57 }
 0x1aa   :  { %1791 = vmatpush3.msra.mxu1 %v174_v51  ;;  %v156_v59 = vpop.permute.xlu1 %155  ;;  %252 = vmatprep.mubr.f32.mxu1 %v2059_v13  ;;  %v660_v51 = vld [vmem:[#allocation8 + $0xa8] sm:$0xff] }
 0x1ab   :  { %1792 = vmatprep.subr.mxu1 %v171_v58  ;;  %vm158_vm3 = vcmp.eq.s32.totalorder %v156_v59, %v150_v55  ;;  %v652_v55 = vld [vmem:[#allocation8 + $0x68] sm:$0xff]  ;;  %v646_v59 = vld [vmem:[#allocation8 + $0x38] sm:$0xff] }
 0x1ac   :  { %v1629_v61 = vsel %vm158_vm3, 1.0, %v2059_v13  ;;  %1793 = vmatpush3.msra.mxu1 %v171_v58  ;;  %v648_v58 = vld [vmem:[#allocation8 + $0x48] sm:$0xff] }
 0x1ad   :  { %1794 = vmatprep.subr.mxu1 %v168_v60  ;;  %1631 = vmatmul.mubr.msk.f32.gmra.mxu1 %vm175_vm1, %v1629_v61 }
 0x1ae   :  { %1795 = vmatpush3.msra.mxu1 %v168_v60  ;;  %1798 = vmatprep.mubr.msk.f32.mxu1 %vm175_vm1, %v1628_v57  ;;  %v649_v57 = vld [vmem:[#allocation8 + $0x50] sm:$0xff] }
 0x1af   :  { %1796 = vmatprep.subr.mxu1 %v165_v62  ;;  %v645_v60 = vld [vmem:[#allocation8 + $0x30] sm:$0xff] }
 0x1b0   :  { %1797 = vmatpush3.msra.mxu1 %v165_v62  ;;  %v642_v62 = vld [vmem:[#allocation8 + $0x18] sm:$0xff] }
 0x1b1   :  { %1640 = vmatprep.subr.mxu1 %v433_v63  ;;  %1799 = vmatmul.mubr.msk.f32.vlgmr.msra.gmra.mxu1 %vm175_vm1, %v1629_v61  ;;  %v643_v61 = vld [vmem:[#allocation8 + $0x20] sm:$0xff]  ;;  %v640_v63 = vld [vmem:[#allocation8 + $0x8] sm:$0xff] }
 0x1b2   :  { %1641 = vmatpush3.msra.mxu1 %v385_v2  ;;  %592 = vmatprep.mubr.f32.mxu1 %v2164_v44  ;;  %v412_v44 = vld [vmem:[#allocation7 + $0x250] sm:$0xff]  ;;  %v639_v2 = vld [vmem:[#allocation8] sm:$0xff] }
 0x1b3   :  { %1642 = vmatprep.subr.mxu1 %v430_v3  ;;  %v733_v3 = vld [vmem:[#allocation8 + $0x2f0] sm:$0xff] }
 0x1b4   :  { %1643 = vmatpush3.msra.mxu1 %v382_v4  ;;  %v732_v4 = vld [vmem:[#allocation8 + $0x2e8] sm:$0xff] }
 0x1b5   :  { %1644 = vmatprep.subr.mxu1 %v427_v5  ;;  %v730_v5 = vld [vmem:[#allocation8 + $0x2d8] sm:$0xff] }
 0x1b6   :  { %1645 = vmatpush3.msra.mxu1 %v379_v6  ;;  %v729_v6 = vld [vmem:[#allocation8 + $0x2d0] sm:$0xff] }
 0x1b7   :  { %1646 = vmatprep.subr.mxu1 %v424_v7  ;;  %v727_v7 = vld [vmem:[#allocation8 + $0x2c0] sm:$0xff] }
 0x1b8   :  { %1647 = vmatpush3.msra.mxu1 %v376_v8  ;;  %v726_v8 = vld [vmem:[#allocation8 + $0x2b8] sm:$0xff] }
 0x1b9   :  { %1648 = vmatprep.subr.mxu1 %v421_v9  ;;  %v724_v9 = vld [vmem:[#allocation8 + $0x2a8] sm:$0xff] }
 0x1ba   :  { %1649 = vmatpush3.msra.mxu1 %v373_v10  ;;  %v723_v10 = vld [vmem:[#allocation8 + $0x2a0] sm:$0xff] }
 0x1bb   :  { %1650 = vmatprep.subr.mxu1 %v418_v11  ;;  %v721_v11 = vld [vmem:[#allocation8 + $0x290] sm:$0xff] }
 0x1bc   :  { %1651 = vmatpush3.msra.mxu1 %v370_v12  ;;  %v720_v12 = vld [vmem:[#allocation8 + $0x288] sm:$0xff] }
 0x1bd   :  { %1652 = vmatprep.subr.mxu1 %v415_v14  ;;  %v718_v14 = vld [vmem:[#allocation8 + $0x278] sm:$0xff] }
 0x1be   :  { %1653 = vmatpush3.msra.mxu1 %v367_v15  ;;  %v717_v15 = vld [vmem:[#allocation8 + $0x270] sm:$0xff] }
 0x1bf   :  { %1654 = vmatprep.subr.mxu1 %v412_v44  ;;  %v715_v44 = vld [vmem:[#allocation8 + $0x260] sm:$0xff] }
 0x1c0   :  { %1655 = vmatpush3.msra.mxu1 %v364_v16  ;;  %v714_v16 = vld [vmem:[#allocation8 + $0x258] sm:$0xff] }
 0x1c1   :  { %1656 = vmatprep.subr.mxu1 %v409_v17  ;;  %v712_v17 = vld [vmem:[#allocation8 + $0x248] sm:$0xff] }
 0x1c2   :  { %1657 = vmatpush3.msra.mxu1 %v361_v18  ;;  %v711_v18 = vld [vmem:[#allocation8 + $0x240] sm:$0xff] }
 0x1c3   :  { %1658 = vmatprep.subr.mxu1 %v406_v19  ;;  %v709_v19 = vld [vmem:[#allocation8 + $0x230] sm:$0xff] }
 0x1c4   :  { %1659 = vmatpush3.msra.mxu1 %v358_v20  ;;  %v708_v20 = vld [vmem:[#allocation8 + $0x228] sm:$0xff] }
 0x1c5   :  { %1660 = vmatprep.subr.mxu1 %v403_v21  ;;  %v706_v21 = vld [vmem:[#allocation8 + $0x218] sm:$0xff] }
 0x1c6   :  { %1661 = vmatpush3.msra.mxu1 %v355_v22  ;;  %v705_v22 = vld [vmem:[#allocation8 + $0x210] sm:$0xff] }
 0x1c7   :  { %1662 = vmatprep.subr.mxu1 %v400_v23  ;;  %v703_v23 = vld [vmem:[#allocation8 + $0x200] sm:$0xff] }
 0x1c8   :  { %1663 = vmatpush3.msra.mxu1 %v352_v24  ;;  %v702_v24 = vld [vmem:[#allocation8 + $0x1f8] sm:$0xff] }
 0x1c9   :  { %1664 = vmatprep.subr.mxu1 %v397_v25  ;;  %v700_v25 = vld [vmem:[#allocation8 + $0x1e8] sm:$0xff] }
 0x1ca   :  { %1665 = vmatpush3.msra.mxu1 %v349_v26  ;;  %v699_v26 = vld [vmem:[#allocation8 + $0x1e0] sm:$0xff] }
 0x1cb   :  { %1666 = vmatprep.subr.mxu1 %v394_v27  ;;  %v697_v27 = vld [vmem:[#allocation8 + $0x1d0] sm:$0xff] }
 0x1cc   :  { %1667 = vmatpush3.msra.mxu1 %v346_v28  ;;  %v696_v28 = vld [vmem:[#allocation8 + $0x1c8] sm:$0xff] }
 0x1cd   :  { %1668 = vmatprep.subr.mxu1 %v391_v29  ;;  %v781_v29 = vld [vmem:[#allocation8 + $0x470] sm:$0xff] }
 0x1ce   :  { %1669 = vmatpush3.msra.mxu1 %v343_v30  ;;  %v780_v30 = vld [vmem:[#allocation8 + $0x468] sm:$0xff]  ;;  %877 = vmatprep.subr.mxu0 %v781_v29 }
 0x1cf   :  { %1670 = vmatprep.subr.mxu1 %v388_v31  ;;  %v778_v31 = vld [vmem:[#allocation8 + $0x458] sm:$0xff]  ;;  %878 = vmatpush1.msra.mxu0 %v780_v30 }
 0x1d0   :  { %1671 = vmatpush3.msra.mxu1 %v340_v32  ;;  %v694_v32 = vld [vmem:[#allocation8 + $0x1b8] sm:$0xff]  ;;  %879 = vmatprep.subr.mxu0 %v778_v31 }
 0x1d1   :  { %593 = vmatmul.mubr.f32.vlgmr.msra.gmra.mxu1 %v2169_v48  ;;  %800 = vmatprep.subr.mxu1 %v685_v33  ;;  %v664_v48 = vld [vmem:[#allocation8 + $0xc8] sm:$0xff]  ;;  %v777_v33 = vld [vmem:[#allocation8 + $0x450] sm:$0xff] }
 0x1d2   :  { %597 = vmatprep.mubr.f32.mxu1 %v2172_v1  ;;  %801 = vmatpush1.msra.mxu1 %v684_v34  ;;  %v655_v1 = vld [vmem:[#allocation8 + $0x80] sm:$0xff]  ;;  %v693_v34 = vld [vmem:[#allocation8 + $0x1b0] sm:$0xff] }
 0x1d3   :  { %802 = vmatprep.subr.mxu1 %v682_v35  ;;  %v691_v35 = vld [vmem:[#allocation8 + $0x1a0] sm:$0xff]  ;;  %880 = vmatpush1.msra.mxu0 %v777_v33 }
 0x1d4   :  { %803 = vmatpush1.msra.mxu1 %v681_v36  ;;  %v690_v36 = vld [vmem:[#allocation8 + $0x198] sm:$0xff] }
 0x1d5   :  { %598 = vmatmul.mubr.f32.gmra.mxu1 %v2183_v53  ;;  %804 = vmatprep.subr.mxu1 %v679_v37  ;;  %v654_v53 = vld [vmem:[#allocation8 + $0x78] sm:$0xff]  ;;  %v688_v37 = vld [vmem:[#allocation8 + $0x188] sm:$0xff] }
 0x1d6   :  { %805 = vmatpush1.msra.mxu1 %v678_v38  ;;  %v687_v38 = vld [vmem:[#allocation8 + $0x180] sm:$0xff] }
 0x1d7   :  { %806 = vmatprep.subr.mxu1 %v676_v39  ;;  %v775_v39 = vld [vmem:[#allocation8 + $0x440] sm:$0xff] }
 0x1d8   :  { %807 = vmatpush1.msra.mxu1 %v675_v40  ;;  %881 = vmatprep.subr.mxu0 %v775_v39  ;;  %v774_v40 = vld [vmem:[#allocation8 + $0x438] sm:$0xff] }
 0x1d9   :  { %808 = vmatprep.subr.mxu1 %v673_v41  ;;  %v2199_v41 = vld [vmem:[#allocation8 + $0x478] sm:$0xff]  ;;  %882 = vmatpush1.msra.mxu0 %v774_v40 }
 0x1da   :  { %809 = vmatpush1.msra.mxu1 %v672_v42  ;;  %v772_v42 = vld [vmem:[#allocation8 + $0x428] sm:$0xff] }
 0x1db   :  { %810 = vmatprep.subr.mxu1 %v670_v43  ;;  %883 = vmatprep.subr.mxu0 %v772_v42  ;;  %v771_v43 = vld [vmem:[#allocation8 + $0x420] sm:$0xff] }
 0x1dc   :  { %811 = vmatpush1.msra.mxu1 %v669_v45  ;;  %884 = vmatpush1.msra.mxu0 %v771_v43  ;;  %v769_v45 = vld [vmem:[#allocation8 + $0x410] sm:$0xff] }
 0x1dd   :  { %812 = vmatprep.subr.mxu1 %v667_v46  ;;  %885 = vmatprep.subr.mxu0 %v769_v45  ;;  %v768_v46 = vld [vmem:[#allocation8 + $0x408] sm:$0xff] }
 0x1de   :  { %813 = vmatpush1.msra.mxu1 %v666_v47  ;;  %886 = vmatpush1.msra.mxu0 %v768_v46  ;;  %v766_v47 = vld [vmem:[#allocation8 + $0x3f8] sm:$0xff] }
 0x1df   :  { %814 = vmatprep.subr.mxu1 %v664_v48  ;;  %887 = vmatprep.subr.mxu0 %v766_v47  ;;  %v765_v48 = vld [vmem:[#allocation8 + $0x3f0] sm:$0xff]  ;;  %v779_v47 = vld [vmem:[#allocation8 + $0x460] sm:$0xff] }
 0x1e0   :  { %815 = vmatpush1.msra.mxu1 %v663_v49  ;;  %888 = vmatpush1.msra.mxu0 %v765_v48  ;;  %v763_v49 = vld [vmem:[#allocation8 + $0x3e0] sm:$0xff] }
 0x1e1   :  { %816 = vmatprep.subr.mxu1 %v661_v50  ;;  %889 = vmatprep.subr.mxu0 %v763_v49  ;;  %v762_v50 = vld [vmem:[#allocation8 + $0x3d8] sm:$0xff] }
 0x1e2   :  { %817 = vmatpush1.msra.mxu1 %v660_v51  ;;  %890 = vmatpush1.msra.mxu0 %v762_v50  ;;  %v760_v51 = vld [vmem:[#allocation8 + $0x3c8] sm:$0xff] }
 0x1e3   :  { %818 = vmatprep.subr.mxu1 %v658_v0  ;;  %891 = vmatprep.subr.mxu0 %v760_v51  ;;  %v759_v0 = vld [vmem:[#allocation8 + $0x3c0] sm:$0xff]  ;;  %v776_v50 = vld [vmem:[#allocation8 + $0x448] sm:$0xff] }
 0x1e4   :  { %819 = vmatpush1.msra.mxu1 %v657_v52  ;;  %892 = vmatpush1.msra.mxu0 %v759_v0  ;;  %v757_v52 = vld [vmem:[#allocation8 + $0x3b0] sm:$0xff] }
 0x1e5   :  { %820 = vmatprep.subr.mxu1 %v655_v1  ;;  %893 = vmatprep.subr.mxu0 %v757_v52  ;;  %v756_v1 = vld [vmem:[#allocation8 + $0x3a8] sm:$0xff]  ;;  %v773_v0 = vld [vmem:[#allocation8 + $0x430] sm:$0xff]  ;;  %v770_v52 = vld [vmem:[#allocation8 + $0x418] sm:$0xff] }
 0x1e6   :  { %821 = vmatpush1.msra.mxu1 %v654_v53  ;;  %894 = vmatpush1.msra.mxu0 %v756_v1  ;;  %v754_v53 = vld [vmem:[#allocation8 + $0x398] sm:$0xff]  ;;  %v767_v1 = vld [vmem:[#allocation8 + $0x400] sm:$0xff] }
 0x1e7   :  { %822 = vmatprep.subr.mxu1 %v652_v55  ;;  %895 = vmatprep.subr.mxu0 %v754_v53  ;;  %v753_v55 = vld [vmem:[#allocation8 + $0x390] sm:$0xff] }
 0x1e8   :  { %823 = vmatpush1.msra.mxu1 %v651_v56  ;;  %896 = vmatpush1.msra.mxu0 %v753_v55  ;;  %v751_v56 = vld [vmem:[#allocation8 + $0x380] sm:$0xff] }
 0x1e9   :  { %824 = vmatprep.subr.mxu1 %v649_v57  ;;  %897 = vmatprep.subr.mxu0 %v751_v56  ;;  %v750_v57 = vld [vmem:[#allocation8 + $0x378] sm:$0xff]  ;;  %v761_v56 = vld [vmem:[#allocation8 + $0x3d0] sm:$0xff] }
 0x1ea   :  { %825 = vmatpush1.msra.mxu1 %v648_v58  ;;  %898 = vmatpush1.msra.mxu0 %v750_v57  ;;  %v748_v58 = vld [vmem:[#allocation8 + $0x368] sm:$0xff] }
 0x1eb   :  { %826 = vmatprep.subr.mxu1 %v646_v59  ;;  %899 = vmatprep.subr.mxu0 %v748_v58  ;;  %v747_v59 = vld [vmem:[#allocation8 + $0x360] sm:$0xff]  ;;  %v758_v58 = vld [vmem:[#allocation8 + $0x3b8] sm:$0xff] }
 0x1ec   :  { %827 = vmatpush1.msra.mxu1 %v645_v60  ;;  %900 = vmatpush1.msra.mxu0 %v747_v59  ;;  %v745_v60 = vld [vmem:[#allocation8 + $0x350] sm:$0xff] }
 0x1ed   :  { %828 = vmatprep.subr.mxu1 %v643_v61  ;;  %901 = vmatprep.subr.mxu0 %v745_v60  ;;  %v744_v61 = vld [vmem:[#allocation8 + $0x348] sm:$0xff] }
 0x1ee   :  { %829 = vmatpush1.msra.mxu1 %v642_v62  ;;  %902 = vmatpush1.msra.mxu0 %v744_v61  ;;  %v742_v62 = vld [vmem:[#allocation8 + $0x338] sm:$0xff]  ;;  %v755_v61 = vld [vmem:[#allocation8 + $0x3a0] sm:$0xff] }
 0x1ef   :  { %830 = vmatprep.subr.mxu1 %v640_v63  ;;  %903 = vmatprep.subr.mxu0 %v742_v62  ;;  %v741_v63 = vld [vmem:[#allocation8 + $0x330] sm:$0xff] }
 0x1f0   :  { %831 = vmatpush1.msra.mxu1 %v639_v2  ;;  %904 = vmatpush1.msra.mxu0 %v741_v63  ;;  %v739_v2 = vld [vmem:[#allocation8 + $0x320] sm:$0xff] }
 0x1f1   :  { %832 = vmatprep.subr.mxu1 %v733_v3  ;;  %905 = vmatprep.subr.mxu0 %v739_v2  ;;  %v738_v3 = vld [vmem:[#allocation8 + $0x318] sm:$0xff]  ;;  %v752_v2 = vld [vmem:[#allocation8 + $0x388] sm:$0xff] }
 0x1f2   :  { %833 = vmatpush2.msra.mxu1 %v732_v4  ;;  %906 = vmatpush1.msra.mxu0 %v738_v3  ;;  %v736_v4 = vld [vmem:[#allocation8 + $0x308] sm:$0xff] }
 0x1f3   :  { %834 = vmatprep.subr.mxu1 %v730_v5  ;;  %907 = vmatprep.subr.mxu0 %v736_v4  ;;  %v735_v5 = vld [vmem:[#allocation8 + $0x300] sm:$0xff] }
 0x1f4   :  { %835 = vmatpush2.msra.mxu1 %v729_v6  ;;  %908 = vmatpush1.msra.mxu0 %v735_v5  ;;  %v734_v6 = vld [vmem:[#allocation8 + $0x2f8] sm:$0xff]  ;;  %v749_v5 = vld [vmem:[#allocation8 + $0x370] sm:$0xff] }
 0x1f5   :  { %836 = vmatprep.subr.mxu1 %v727_v7  ;;  %1678 = vmatprep.subr.mxu0 %v734_v6  ;;  %v2203_v7 = vshrl.u32 %v149_v54, 7 }
 0x1f6   :  { %837 = vmatpush2.msra.mxu1 %v726_v8  ;;  %v517_v8 = vpop.f32.mrf.mxu0 }
 0x1f7   :  { %838 = vmatprep.subr.mxu1 %v724_v9  ;;  %v2206_v9 = vsub.s32 0, %v2203_v7  ;;  %v2234_v55 = vsub.s32 2, %v2203_v7 }
 0x1f8   :  { %839 = vmatpush2.msra.mxu1 %v723_v10  ;;  %v2211_v10 = vld [vmem:[%s2287_s4] sm:$0x7] }
 0x1f9   :  { %840 = vmatprep.subr.mxu1 %v721_v11  ;;  %v2214_v11 = vsub.s32 1, %v2203_v7  ;;  %v447_v60 = vrot.slane %v2211_v10, %v2234_v55 }
 0x1fa   :  { %841 = vmatpush2.msra.mxu1 %v720_v12  ;;  %v519_v12 = vpop.f32.mrf.mxu0 }
 0x1fb   :  { %842 = vmatprep.subr.mxu1 %v718_v14  ;;  %v439_v14 = vrot.slane %v2211_v10, %v2206_v9  ;;  %v443_v54 = vrot.slane %v2211_v10, %v2214_v11 }
 0x1fc   :  { %843 = vmatpush2.msra.mxu1 %v717_v15  ;;  %v523_v15 = vpop.f32.mrf.mxu0 }
 0x1fd   :  { %844 = vmatprep.subr.mxu1 %v715_v44  ;;  %v518_v44 = vadd.f32 %v517_v8, %v439_v14 }
 0x1fe   :  { %845 = vmatpush2.msra.mxu1 %v714_v16  ;;  %v520_v16 = vadd.f32 %v519_v12, %v443_v54  ;;  %v746_v12 = vld [vmem:[#allocation8 + $0x358] sm:$0xff] }
 0x1ff   :  { %846 = vmatprep.subr.mxu1 %v712_v17 }
 0x200   :  { %847 = vmatpush2.msra.mxu1 %v711_v18  ;;  %v525_v18 = vpop.f32.mrf.mxu0 }
 0x201   :  { %848 = vmatprep.subr.mxu1 %v709_v19 }
 0x202   :  { %849 = vmatpush2.msra.mxu1 %v708_v20  ;;  %v524_v20 = vadd.f32 %v523_v15, %v439_v14 }
 0x203   :  { %850 = vmatprep.subr.mxu1 %v706_v21 }
 0x204   :  { %851 = vmatpush2.msra.mxu1 %v705_v22 }
 0x205   :  { %852 = vmatprep.subr.mxu1 %v703_v23 }
 0x206   :  { %853 = vmatpush2.msra.mxu1 %v702_v24  ;;  %v526_v24 = vadd.f32 %v525_v18, %v443_v54  ;;  %v743_v54 = vld [vmem:[#allocation8 + $0x340] sm:$0xff] }
 0x207   :  { %854 = vmatprep.subr.mxu1 %v700_v25 }
 0x208   :  { %855 = vmatpush2.msra.mxu1 %v699_v26 }
 0x209   :  { %856 = vmatprep.subr.mxu1 %v697_v27 }
 0x20a   :  { %857 = vmatpush2.msra.mxu1 %v696_v28 }
 0x20b   :  { %858 = vmatprep.subr.mxu1 %v694_v32 }
 0x20c   :  { %859 = vmatpush2.msra.mxu1 %v693_v34 }
 0x20d   :  { %860 = vmatprep.subr.mxu1 %v691_v35 }
 0x20e   :  { %861 = vmatpush2.msra.mxu1 %v690_v36 }
 0x20f   :  { %862 = vmatprep.subr.mxu1 %v688_v37 }
 0x210   :  { %863 = vmatpush2.msra.mxu1 %v687_v38 }
 0x211   :  { %1801 = vmatprep.subr.mxu1 %v2199_v41 }
 0x269   :  { %v248_v17 = vpop.f32.mrf.mxu1 }
 0x26a   :  { %v603_v19 = vadd.f32 %v518_v44, %v248_v17  ;;  %v740_v44 = vld [vmem:[#allocation8 + $0x328] sm:$0xff]  ;;  %v737_v17 = vld [vmem:[#allocation8 + $0x310] sm:$0xff] }
 0x26b   :  { %v250_v21 = vpop.f32.mrf.mxu1 }
 0x26c   :  { %v615_v22 = vmul.f32 0.70710677, %v603_v19  ;;  %v604_v23 = vadd.f32 %v520_v16, %v250_v21  ;;  %v609_v38 = vmul.f32 0.5, %v603_v19 }
 0x26d   :  { %v254_v25 = vpop.f32.mrf.mxu1 }
 0x26e   :  { %1897 = verf.f32 %v615_v22  ;;  %v616_v26 = vmul.f32 0.70710677, %v604_v23  ;;  %v606_v27 = vadd.f32 %v524_v20, %v254_v25  ;;  %v610_v35 = vmul.f32 0.5, %v604_v23  ;;  %v686_v22 = vld [vmem:[#allocation8 + $0x178] sm:$0xff]  ;;  %v683_v25 = vld [vmem:[#allocation8 + $0x160] sm:$0xff] }
 0x26f   :  { %v256_v28 = vpop.f32.mrf.mxu1 }
 0x270   :  { %1899 = verf.f32 %v616_v26  ;;  %v618_v29 = vmul.f32 0.70710677, %v606_v27  ;;  %v607_v30 = vadd.f32 %v526_v24, %v256_v28  ;;  %v612_v48 = vmul.f32 0.5, %v606_v27  ;;  %v731_v24 = vld [vmem:[#allocation8 + $0x2e0] sm:$0xff]  ;;  %v728_v28 = vld [vmem:[#allocation8 + $0x2c8] sm:$0xff] }
 0x271   :  { %v1800_v53 = vpop.f32.mrf.mxu1 }
 0x272   :  { %1901 = verf.f32 %v618_v29  ;;  %v619_v31 = vmul.f32 0.70710677, %v607_v30  ;;  %v613_v45 = vmul.f32 0.5, %v607_v30  ;;  %v680_v30 = vld [vmem:[#allocation8 + $0x148] sm:$0xff] }
 0x273   :  { %v325_v57 = vpop.f32.mrf.mxu1 }
 0x274   :  { %1903 = verf.f32 %v619_v31  ;;  %v725_v31 = vld [vmem:[#allocation8 + $0x2b0] sm:$0xff] }
 0x27b   :  { %v1898_v32 = vpop.eup %1897 }
 0x27c   :  { %v627_v34 = vadd.f32 1.0, %v1898_v32  ;;  %v677_v32 = vld [vmem:[#allocation8 + $0x130] sm:$0xff] }
 0x27d   :  { %v1900_v33 = vpop.eup %1899 }
 0x27e   :  { %v628_v36 = vadd.f32 1.0, %v1900_v33  ;;  %v2222_v42 = vmul.f32 %v627_v34, %v609_v38  ;;  %v722_v33 = vld [vmem:[#allocation8 + $0x298] sm:$0xff]  ;;  %v668_v38 = vld [vmem:[#allocation8 + $0xe8] sm:$0xff] }
 0x27f   :  { %v1902_v37 = vpop.eup %1901  ;;  %v674_v34 = vld [vmem:[#allocation8 + $0x118] sm:$0xff] }
 0x280   :  { %v2220_v39 = vmul.f32 %v628_v36, %v610_v35  ;;  %v630_v43 = vadd.f32 1.0, %v1902_v37  ;;  %v719_v35 = vld [vmem:[#allocation8 + $0x280] sm:$0xff]  ;;  %v716_v37 = vld [vmem:[#allocation8 + $0x268] sm:$0xff] }
 0x281   :  { %v1904_v40 = vpop.eup %1903  ;;  %v671_v36 = vld [vmem:[#allocation8 + $0x100] sm:$0xff] }
 0x282   :  { %864 = vmatprep.mubr.f32.mxu1 %v2220_v39  ;;  %v631_v46 = vadd.f32 1.0, %v1904_v40  ;;  %v2229_v51 = vmul.f32 %v630_v43, %v612_v48  ;;  %v713_v40 = vld [vmem:[#allocation8 + $0x250] sm:$0xff]  ;;  %v704_v48 = vld [vmem:[#allocation8 + $0x208] sm:$0xff] }
 0x283   :  { %865 = vmatmul.mubr.f32.vlgmr.msra.gmra.mxu1 %v2222_v42  ;;  %v665_v43 = vld [vmem:[#allocation8 + $0xd0] sm:$0xff] }
 0x284   :  { %v2226_v49 = vmul.f32 %v631_v46, %v613_v45  ;;  %1802 = vmatpush3.msra.mxu1 %v2199_v41  ;;  %v764_v41 = vld [vmem:[#allocation8 + $0x3e8] sm:$0xff]  ;;  %v710_v45 = vld [vmem:[#allocation8 + $0x238] sm:$0xff] }
 0x285   :  { %1803 = vmatprep.subr.mxu1 %v779_v47  ;;  %v662_v46 = vld [vmem:[#allocation8 + $0xb8] sm:$0xff] }
 0x286   :  { %870 = vmatprep.mubr.f32.mxu1 %v2226_v49  ;;  %1804 = vmatpush3.msra.mxu1 %v779_v47  ;;  %v659_v47 = vld [vmem:[#allocation8 + $0xa0] sm:$0xff] }
 0x287   :  { %871 = vmatmul.mubr.f32.gmra.mxu1 %v2229_v51  ;;  %1805 = vmatprep.subr.mxu1 %v776_v50 }
 0x288   :  { %1806 = vmatpush3.msra.mxu1 %v776_v50  ;;  %v656_v50 = vld [vmem:[#allocation8 + $0x88] sm:$0xff] }
 0x289   :  { %1807 = vmatprep.subr.mxu1 %v773_v0 }
 0x28a   :  { %1808 = vmatpush3.msra.mxu1 %v773_v0  ;;  %v701_v0 = vld [vmem:[#allocation8 + $0x1f0] sm:$0xff] }
 0x28b   :  { %1809 = vmatprep.subr.mxu1 %v770_v52 }
 0x28c   :  { %1810 = vmatpush3.msra.mxu1 %v770_v52  ;;  %v653_v52 = vld [vmem:[#allocation8 + $0x70] sm:$0xff] }
 0x28d   :  { %1811 = vmatprep.subr.mxu1 %v767_v1 }
 0x28e   :  { %1812 = vmatpush3.msra.mxu1 %v767_v1  ;;  %v698_v1 = vld [vmem:[#allocation8 + $0x1d8] sm:$0xff] }
 0x28f   :  { %1813 = vmatprep.subr.mxu1 %v764_v41 }
 0x290   :  { %1814 = vmatpush3.msra.mxu1 %v764_v41  ;;  %v695_v41 = vld [vmem:[#allocation8 + $0x1c0] sm:$0xff] }
 0x291   :  { %v1672_v59 = vpop.f32.mrf.mxu1  ;;  %1815 = vmatprep.subr.mxu1 %v761_v56 }
 0x292   :  { %1816 = vmatpush3.msra.mxu1 %v761_v56  ;;  %v647_v56 = vld [vmem:[#allocation8 + $0x40] sm:$0xff] }
 0x293   :  { %v1673_v62 = vpop.f32.mrf.mxu1  ;;  %1817 = vmatprep.subr.mxu1 %v758_v58 }
 0x294   :  { %v1674_v63 = vadd.f32 %v1673_v62, %v1672_v59  ;;  %1818 = vmatpush3.msra.mxu1 %v758_v58  ;;  %v644_v58 = vld [vmem:[#allocation8 + $0x28] sm:$0xff]  ;;  %v689_v59 = vld [vmem:[#allocation8 + $0x190] sm:$0xff] }
 0x295   :  { %v1675_v3 = vpop.f32.mrf.mxu1  ;;  %1819 = vmatprep.subr.mxu1 %v755_v61  ;;  %v1179_v62 = vld [vmem:[#allocation10 + $0x168] sm:$0xff] }
 0x296   :  { %v595_v4 = vadd.f32 %v1674_v63, %v447_v60  ;;  %1820 = vmatpush3.msra.mxu1 %v755_v61  ;;  %v1180_v61 = vld [vmem:[#allocation10 + $0x170] sm:$0xff]  ;;  %v1177_v63 = vld [vmem:[#allocation10 + $0x158] sm:$0xff] }
 0x297   :  { %v1676_v6 = vpop.f32.mrf.mxu1  ;;  %1821 = vmatprep.subr.mxu1 %v752_v2 }
 0x298   :  { %v605_v7 = vadd.f32 %v595_v4, %v325_v57  ;;  %v1677_v8 = vadd.f32 %v1676_v6, %v1675_v3  ;;  %1822 = vmatpush3.msra.mxu1 %v752_v2  ;;  %v692_v57 = vld [vmem:[#allocation8 + $0x1a8] sm:$0xff]  ;;  %v1176_v2 = vld [vmem:[#allocation10 + $0x150] sm:$0xff]  ;;  %v1174_v3 = vld [vmem:[#allocation10 + $0x140] sm:$0xff] }
 0x299   :  { %1823 = vmatprep.subr.mxu1 %v749_v5  ;;  %v1173_v4 = vld [vmem:[#allocation10 + $0x138] sm:$0xff]  ;;  %v1170_v6 = vld [vmem:[#allocation10 + $0x120] sm:$0xff] }
 0x29a   :  { %v617_v10 = vmul.f32 0.70710677, %v605_v7  ;;  %v600_v14 = vadd.f32 %v1677_v8, %v447_v60  ;;  %1824 = vmatpush3.msra.mxu1 %v749_v5  ;;  %v611_v19 = vmul.f32 0.5, %v605_v7  ;;  %v641_v60 = vld [vmem:[#allocation8 + $0x10] sm:$0xff]  ;;  %v1171_v5 = vld [vmem:[#allocation10 + $0x128] sm:$0xff] }
 0x29b   :  { %1825 = vmatprep.subr.mxu1 %v746_v12  ;;  %v1168_v7 = vld [vmem:[#allocation10 + $0x110] sm:$0xff]  ;;  %v1167_v8 = vld [vmem:[#allocation10 + $0x108] sm:$0xff] }
 0x29c   :  { %1905 = verf.f32 %v617_v10  ;;  %v608_v15 = vadd.f32 %v1800_v53, %v600_v14  ;;  %1826 = vmatpush3.msra.mxu1 %v746_v12  ;;  %v650_v53 = vld [vmem:[#allocation8 + $0x58] sm:$0xff]  ;;  %v1164_v12 = vld [vmem:[#allocation10 + $0xf0] sm:$0xff]  ;;  %v1159_v14 = vld [vmem:[#allocation10 + $0xc8] sm:$0xff] }
 0x29d   :  { %1827 = vmatprep.subr.mxu1 %v743_v54  ;;  %v1161_v10 = vld [vmem:[#allocation10 + $0xd8] sm:$0xff] }
 0x29e   :  { %v620_v16 = vmul.f32 0.70710677, %v608_v15  ;;  %1828 = vmatpush3.msra.mxu1 %v743_v54  ;;  %v614_v26 = vmul.f32 0.5, %v608_v15  ;;  %v1158_v54 = vld [vmem:[#allocation10 + $0xc0] sm:$0xff]  ;;  %v1155_v15 = vld [vmem:[#allocation10 + $0xa8] sm:$0xff] }
 0x29f   :  { %1829 = vmatprep.subr.mxu1 %v740_v44 }
 0x2a0   :  { %1907 = verf.f32 %v620_v16  ;;  %1830 = vmatpush3.msra.mxu1 %v740_v44  ;;  %v1153_v44 = vld [vmem:[#allocation10 + $0x98] sm:$0xff]  ;;  %v1152_v16 = vld [vmem:[#allocation10 + $0x90] sm:$0xff] }
 0x2a1   :  { %1831 = vmatprep.subr.mxu1 %v737_v17 }
 0x2a2   :  { %1832 = vmatpush3.msra.mxu1 %v737_v17  ;;  %v1150_v17 = vld [vmem:[#allocation10 + $0x80] sm:$0xff] }
 0x2a9   :  { %v1906_v18 = vpop.eup %1905 }
 0x2aa   :  { %v629_v20 = vadd.f32 1.0, %v1906_v18  ;;  %v1149_v18 = vld [vmem:[#allocation10 + $0x78] sm:$0xff] }
 0x2ac   :  { %v635_v21 = vmul.f32 %v629_v20, %v611_v19  ;;  %v1147_v19 = vld [vmem:[#allocation10 + $0x68] sm:$0xff]  ;;  %v1146_v20 = vld [vmem:[#allocation10 + $0x60] sm:$0xff] }
 0x2ad   :  { %v1908_v23 = vpop.eup %1907 }
 0x2ae   :  { %942 = vmatmul.mubr.f32.vlgmr.msra.gmra.mxu0 %v635_v21  ;;  %1833 = vmatprep.mubr.f32.mxu1 %v635_v21  ;;  %v632_v27 = vadd.f32 1.0, %v1908_v23  ;;  %v1144_v21 = vld [vmem:[#allocation10 + $0x50] sm:$0xff]  ;;  %v1141_v23 = vld [vmem:[#allocation10 + $0x38] sm:$0xff] }
 0x2af   :  { %1679 = vmatpush3.msra.mxu0 %v686_v22  ;;  %947 = vmatprep.mubr.f32.mxu0 %v2059_v13  ;;  %v1143_v22 = vld [vmem:[#allocation10 + $0x48] sm:$0xff] }
 0x2b0   :  { %1680 = vmatprep.subr.mxu0 %v731_v24  ;;  %v638_v29 = vmul.f32 %v632_v27, %v614_v26  ;;  %v1140_v24 = vld [vmem:[#allocation10 + $0x30] sm:$0xff]  ;;  %v1137_v26 = vld [vmem:[#allocation10 + $0x18] sm:$0xff]  ;;  %v1135_v27 = vld [vmem:[#allocation10 + $0x8] sm:$0xff] }
 0x2b1   :  { %1681 = vmatpush3.msra.mxu0 %v683_v25  ;;  %v1138_v25 = vld [vmem:[#allocation10 + $0x20] sm:$0xff] }
 0x2b2   :  { %1682 = vmatprep.subr.mxu0 %v728_v28  ;;  %948 = vmatmul.mubr.f32.gmra.mxu0 %v638_v29  ;;  %v1134_v28 = vld [vmem:[#allocation10] sm:$0xff] }
 0x2b3   :  { %1683 = vmatpush3.msra.mxu0 %v680_v30  ;;  %1834 = vmatmul.mubr.f32.vlgmr.msra.gmra.mxu1 %v638_v29  ;;  %v1228_v29 = vld [vmem:[#allocation10 + $0x2f0] sm:$0xff]  ;;  %v1227_v30 = vld [vmem:[#allocation10 + $0x2e8] sm:$0xff] }
 0x2b4   :  { %1684 = vmatprep.subr.mxu0 %v725_v31  ;;  %1018 = vmatprep.mubr.f32.mxu0 %v2220_v39  ;;  %v707_v39 = vld [vmem:[#allocation8 + $0x220] sm:$0xff]  ;;  %v1225_v31 = vld [vmem:[#allocation10 + $0x2d8] sm:$0xff] }
 0x2b5   :  { %1685 = vmatpush3.msra.mxu0 %v677_v32  ;;  %1436 = vmatprep.mubr.f32.mxu1 %v2059_v13  ;;  %v1224_v32 = vld [vmem:[#allocation10 + $0x2d0] sm:$0xff] }
 0x2b6   :  { %1686 = vmatprep.subr.mxu0 %v722_v33  ;;  %v1222_v33 = vld [vmem:[#allocation10 + $0x2c0] sm:$0xff] }
 0x2b7   :  { %1687 = vmatpush3.msra.mxu0 %v674_v34  ;;  %v1221_v34 = vld [vmem:[#allocation10 + $0x2b8] sm:$0xff] }
 0x2b8   :  { %1688 = vmatprep.subr.mxu0 %v719_v35  ;;  %v1219_v35 = vld [vmem:[#allocation10 + $0x2a8] sm:$0xff] }
 0x2b9   :  { %1689 = vmatpush3.msra.mxu0 %v671_v36  ;;  %v1218_v36 = vld [vmem:[#allocation10 + $0x2a0] sm:$0xff] }
 0x2ba   :  { %1690 = vmatprep.subr.mxu0 %v716_v37  ;;  %v1216_v37 = vld [vmem:[#allocation10 + $0x290] sm:$0xff] }
 0x2bb   :  { %1691 = vmatpush3.msra.mxu0 %v668_v38  ;;  %v1215_v38 = vld [vmem:[#allocation10 + $0x288] sm:$0xff] }
 0x2bc   :  { %1692 = vmatprep.subr.mxu0 %v713_v40  ;;  %v1213_v40 = vld [vmem:[#allocation10 + $0x278] sm:$0xff] }
 0x2bd   :  { %1693 = vmatpush3.msra.mxu0 %v665_v43  ;;  %v1212_v43 = vld [vmem:[#allocation10 + $0x270] sm:$0xff] }
 0x2be   :  { %1694 = vmatprep.subr.mxu0 %v710_v45  ;;  %v1210_v45 = vld [vmem:[#allocation10 + $0x260] sm:$0xff] }
 0x2bf   :  { %1695 = vmatpush3.msra.mxu0 %v662_v46  ;;  %v1209_v46 = vld [vmem:[#allocation10 + $0x258] sm:$0xff] }
 0x2c0   :  { %1696 = vmatprep.subr.mxu0 %v707_v39  ;;  %v1207_v39 = vld [vmem:[#allocation10 + $0x248] sm:$0xff] }
 0x2c1   :  { %1697 = vmatpush3.msra.mxu0 %v659_v47  ;;  %v1206_v47 = vld [vmem:[#allocation10 + $0x240] sm:$0xff] }
 0x2c2   :  { %1698 = vmatprep.subr.mxu0 %v704_v48  ;;  %v1204_v48 = vld [vmem:[#allocation10 + $0x230] sm:$0xff] }
 0x2c3   :  { %1699 = vmatpush3.msra.mxu0 %v656_v50  ;;  %v1203_v50 = vld [vmem:[#allocation10 + $0x228] sm:$0xff] }
 0x2c4   :  { %1700 = vmatprep.subr.mxu0 %v701_v0  ;;  %v1201_v0 = vld [vmem:[#allocation10 + $0x218] sm:$0xff] }
 0x2c5   :  { %1701 = vmatpush3.msra.mxu0 %v653_v52  ;;  %v1200_v52 = vld [vmem:[#allocation10 + $0x210] sm:$0xff] }
 0x2c6   :  { %1702 = vmatprep.subr.mxu0 %v698_v1  ;;  %v1198_v1 = vld [vmem:[#allocation10 + $0x200] sm:$0xff] }
 0x2c7   :  { %1703 = vmatpush3.msra.mxu0 %v650_v53  ;;  %v1197_v53 = vld [vmem:[#allocation10 + $0x1f8] sm:$0xff] }
 0x2c8   :  { %1704 = vmatprep.subr.mxu0 %v695_v41  ;;  %v1195_v41 = vld [vmem:[#allocation10 + $0x1e8] sm:$0xff] }
 0x2c9   :  { %1705 = vmatpush3.msra.mxu0 %v647_v56  ;;  %v1194_v56 = vld [vmem:[#allocation10 + $0x1e0] sm:$0xff] }
 0x2ca   :  { %1706 = vmatprep.subr.mxu0 %v692_v57  ;;  %v1192_v57 = vld [vmem:[#allocation10 + $0x1d0] sm:$0xff] }
 0x2cb   :  { %1707 = vmatpush3.msra.mxu0 %v644_v58  ;;  %v1191_v58 = vld [vmem:[#allocation10 + $0x1c8] sm:$0xff] }
 0x2cc   :  { %1708 = vmatprep.subr.mxu0 %v689_v59  ;;  %v1189_v59 = vld [vmem:[#allocation10 + $0x1b8] sm:$0xff] }
 0x2cd   :  { %1709 = vmatpush3.msra.mxu0 %v641_v60  ;;  %v1188_v60 = vld [vmem:[#allocation10 + $0x1b0] sm:$0xff] }
 0x2ce   :  { %1019 = vmatmul.mubr.f32.vlgmr.msra.gmra.mxu0 %v2222_v42  ;;  %1295 = vmatprep.subr.mxu0 %v1180_v61  ;;  %v1165_v42 = vld [vmem:[#allocation10 + $0xf8] sm:$0xff]  ;;  %v1186_v61 = vld [vmem:[#allocation10 + $0x1a0] sm:$0xff] }
 0x2cf   :  { %1023 = vmatprep.mubr.f32.mxu0 %v2226_v49  ;;  %1296 = vmatpush1.msra.mxu0 %v1179_v62  ;;  %v1162_v49 = vld [vmem:[#allocation10 + $0xe0] sm:$0xff]  ;;  %v1185_v62 = vld [vmem:[#allocation10 + $0x198] sm:$0xff] }
 0x2d0   :  { %1297 = vmatprep.subr.mxu0 %v1177_v63  ;;  %v1276_v63 = vld [vmem:[#allocation10 + $0x470] sm:$0xff] }
 0x2d1   :  { %1298 = vmatpush1.msra.mxu0 %v1176_v2  ;;  %v1275_v2 = vld [vmem:[#allocation10 + $0x468] sm:$0xff]  ;;  %1372 = vmatprep.subr.mxu1 %v1276_v63 }
 0x2d2   :  { %1024 = vmatmul.mubr.f32.gmra.mxu0 %v2229_v51  ;;  %1299 = vmatprep.subr.mxu0 %v1174_v3  ;;  %v1156_v51 = vld [vmem:[#allocation10 + $0xb0] sm:$0xff]  ;;  %v1183_v3 = vld [vmem:[#allocation10 + $0x188] sm:$0xff] }
 0x2d3   :  { %1300 = vmatpush1.msra.mxu0 %v1173_v4  ;;  %v1182_v4 = vld [vmem:[#allocation10 + $0x180] sm:$0xff]  ;;  %1373 = vmatpush1.msra.mxu1 %v1275_v2 }
 0x2d4   :  { %1301 = vmatprep.subr.mxu0 %v1171_v5  ;;  %v1273_v5 = vld [vmem:[#allocation10 + $0x458] sm:$0xff] }
 0x2d5   :  { %1302 = vmatpush1.msra.mxu0 %v1170_v6  ;;  %1374 = vmatprep.subr.mxu1 %v1273_v5  ;;  %v1272_v6 = vld [vmem:[#allocation10 + $0x450] sm:$0xff] }
 0x2d6   :  { %1303 = vmatprep.subr.mxu0 %v1168_v7  ;;  %1375 = vmatpush1.msra.mxu1 %v1272_v6  ;;  %v1270_v7 = vld [vmem:[#allocation10 + $0x440] sm:$0xff] }
 0x2d7   :  { %1304 = vmatpush1.msra.mxu0 %v1167_v8  ;;  %1376 = vmatprep.subr.mxu1 %v1270_v7  ;;  %v1269_v8 = vld [vmem:[#allocation10 + $0x438] sm:$0xff] }
 0x2d8   :  { %1305 = vmatprep.subr.mxu0 %v1165_v42  ;;  %v2244_v42 = vld [vmem:[#allocation10 + $0x478] sm:$0xff]  ;;  %1377 = vmatpush1.msra.mxu1 %v1269_v8 }
 0x2d9   :  { %1306 = vmatpush1.msra.mxu0 %v1164_v12  ;;  %v1267_v12 = vld [vmem:[#allocation10 + $0x428] sm:$0xff] }
 0x2da   :  { %1307 = vmatprep.subr.mxu0 %v1162_v49  ;;  %1378 = vmatprep.subr.mxu1 %v1267_v12  ;;  %v1266_v49 = vld [vmem:[#allocation10 + $0x420] sm:$0xff] }
 0x2db   :  { %1308 = vmatpush1.msra.mxu0 %v1161_v10  ;;  %1379 = vmatpush1.msra.mxu1 %v1266_v49  ;;  %v1264_v10 = vld [vmem:[#allocation10 + $0x410] sm:$0xff] }
 0x2dc   :  { %1309 = vmatprep.subr.mxu0 %v1159_v14  ;;  %1380 = vmatprep.subr.mxu1 %v1264_v10  ;;  %v1263_v14 = vld [vmem:[#allocation10 + $0x408] sm:$0xff] }
 0x2dd   :  { %1310 = vmatpush1.msra.mxu0 %v1158_v54  ;;  %1381 = vmatpush1.msra.mxu1 %v1263_v14  ;;  %v1261_v54 = vld [vmem:[#allocation10 + $0x3f8] sm:$0xff] }
 0x2de   :  { %1311 = vmatprep.subr.mxu0 %v1156_v51  ;;  %1382 = vmatprep.subr.mxu1 %v1261_v54  ;;  %v1260_v51 = vld [vmem:[#allocation10 + $0x3f0] sm:$0xff]  ;;  %v1274_v54 = vld [vmem:[#allocation10 + $0x460] sm:$0xff] }
 0x2df   :  { %1312 = vmatpush1.msra.mxu0 %v1155_v15  ;;  %1383 = vmatpush1.msra.mxu1 %v1260_v51  ;;  %v1258_v15 = vld [vmem:[#allocation10 + $0x3e0] sm:$0xff] }
 0x2e0   :  { %1313 = vmatprep.subr.mxu0 %v1153_v44  ;;  %1384 = vmatprep.subr.mxu1 %v1258_v15  ;;  %v1257_v44 = vld [vmem:[#allocation10 + $0x3d8] sm:$0xff] }
 0x2e1   :  { %1314 = vmatpush1.msra.mxu0 %v1152_v16  ;;  %1385 = vmatpush1.msra.mxu1 %v1257_v44  ;;  %v1255_v16 = vld [vmem:[#allocation10 + $0x3c8] sm:$0xff] }
 0x2e2   :  { %1315 = vmatprep.subr.mxu0 %v1150_v17  ;;  %1386 = vmatprep.subr.mxu1 %v1255_v16  ;;  %v1254_v17 = vld [vmem:[#allocation10 + $0x3c0] sm:$0xff]  ;;  %v1271_v44 = vld [vmem:[#allocation10 + $0x448] sm:$0xff] }
 0x2e3   :  { %1316 = vmatpush1.msra.mxu0 %v1149_v18  ;;  %1387 = vmatpush1.msra.mxu1 %v1254_v17  ;;  %v1252_v18 = vld [vmem:[#allocation10 + $0x3b0] sm:$0xff] }
 0x2e4   :  { %1317 = vmatprep.subr.mxu0 %v1147_v19  ;;  %1388 = vmatprep.subr.mxu1 %v1252_v18  ;;  %v1251_v19 = vld [vmem:[#allocation10 + $0x3a8] sm:$0xff]  ;;  %v1268_v17 = vld [vmem:[#allocation10 + $0x430] sm:$0xff]  ;;  %v1265_v18 = vld [vmem:[#allocation10 + $0x418] sm:$0xff] }
 0x2e5   :  { %1318 = vmatpush1.msra.mxu0 %v1146_v20  ;;  %1389 = vmatpush1.msra.mxu1 %v1251_v19  ;;  %v1249_v20 = vld [vmem:[#allocation10 + $0x398] sm:$0xff] }
 0x2e6   :  { %1319 = vmatprep.subr.mxu0 %v1144_v21  ;;  %1390 = vmatprep.subr.mxu1 %v1249_v20  ;;  %v1248_v21 = vld [vmem:[#allocation10 + $0x390] sm:$0xff] }
 0x2e7   :  { %1320 = vmatpush1.msra.mxu0 %v1143_v22  ;;  %1391 = vmatpush1.msra.mxu1 %v1248_v21  ;;  %v1246_v22 = vld [vmem:[#allocation10 + $0x380] sm:$0xff] }
 0x2e8   :  { %1321 = vmatprep.subr.mxu0 %v1141_v23  ;;  %v1245_v23 = vld [vmem:[#allocation10 + $0x378] sm:$0xff]  ;;  %1392 = vmatprep.subr.mxu1 %v1246_v22  ;;  %v1262_v21 = vld [vmem:[#allocation10 + $0x400] sm:$0xff] }
 0x2e9   :  { %1322 = vmatpush1.msra.mxu0 %v1140_v24  ;;  %v1243_v24 = vld [vmem:[#allocation10 + $0x368] sm:$0xff]  ;;  %1393 = vmatpush1.msra.mxu1 %v1245_v23 }
 0x2ea   :  { %1323 = vmatprep.subr.mxu0 %v1138_v25  ;;  %v1242_v25 = vld [vmem:[#allocation10 + $0x360] sm:$0xff]  ;;  %1394 = vmatprep.subr.mxu1 %v1243_v24  ;;  %v1259_v24 = vld [vmem:[#allocation10 + $0x3e8] sm:$0xff] }
 0x2eb   :  { %1324 = vmatpush1.msra.mxu0 %v1137_v26  ;;  %v1240_v26 = vld [vmem:[#allocation10 + $0x350] sm:$0xff]  ;;  %1395 = vmatpush1.msra.mxu1 %v1242_v25 }
 0x2ec   :  { %1325 = vmatprep.subr.mxu0 %v1135_v27  ;;  %v1239_v27 = vld [vmem:[#allocation10 + $0x348] sm:$0xff]  ;;  %1396 = vmatprep.subr.mxu1 %v1240_v26 }
 0x2ed   :  { %1326 = vmatpush1.msra.mxu0 %v1134_v28  ;;  %v1237_v28 = vld [vmem:[#allocation10 + $0x338] sm:$0xff]  ;;  %1397 = vmatpush1.msra.mxu1 %v1239_v27  ;;  %v1256_v27 = vld [vmem:[#allocation10 + $0x3d0] sm:$0xff] }
 0x2ee   :  { %1327 = vmatprep.subr.mxu0 %v1228_v29  ;;  %v1236_v29 = vld [vmem:[#allocation10 + $0x330] sm:$0xff]  ;;  %1398 = vmatprep.subr.mxu1 %v1237_v28 }
 0x2ef   :  { %1328 = vmatpush2.msra.mxu0 %v1227_v30  ;;  %v1234_v30 = vld [vmem:[#allocation10 + $0x320] sm:$0xff]  ;;  %1399 = vmatpush1.msra.mxu1 %v1236_v29 }
 0x2f0   :  { %1329 = vmatprep.subr.mxu0 %v1225_v31  ;;  %v1233_v31 = vld [vmem:[#allocation10 + $0x318] sm:$0xff]  ;;  %1400 = vmatprep.subr.mxu1 %v1234_v30 }
 0x2f1   :  { %1330 = vmatpush2.msra.mxu0 %v1224_v32  ;;  %v1231_v32 = vld [vmem:[#allocation10 + $0x308] sm:$0xff]  ;;  %1401 = vmatpush1.msra.mxu1 %v1233_v31 }
 0x2f2   :  { %1331 = vmatprep.subr.mxu0 %v1222_v33  ;;  %v1230_v33 = vld [vmem:[#allocation10 + $0x300] sm:$0xff]  ;;  %1402 = vmatprep.subr.mxu1 %v1231_v32  ;;  %v1253_v32 = vld [vmem:[#allocation10 + $0x3b8] sm:$0xff] }
 0x2f3   :  { %1332 = vmatpush2.msra.mxu0 %v1221_v34  ;;  %v1229_v34 = vld [vmem:[#allocation10 + $0x2f8] sm:$0xff]  ;;  %1403 = vmatpush1.msra.mxu1 %v1230_v33 }
 0x2f4   :  { %1333 = vmatprep.subr.mxu0 %v1219_v35  ;;  %1734 = vmatprep.subr.mxu1 %v1229_v34 }
 0x2f5   :  { %1334 = vmatpush2.msra.mxu0 %v1218_v36  ;;  %v783_v36 = vld [vmem:[%s2289_s6] sm:$0x7] }
 0x2f6   :  { %1335 = vmatprep.subr.mxu0 %v1216_v37  ;;  %v796_v20 = vrot.slane %v783_v36, %v2234_v55 }
 0x2f7   :  { %1336 = vmatpush2.msra.mxu0 %v1215_v38  ;;  %v788_v38 = vrot.slane %v783_v36, %v2206_v9 }
 0x2f8   :  { %1337 = vmatprep.subr.mxu0 %v1213_v40  ;;  %v792_v40 = vrot.slane %v783_v36, %v2214_v11 }
 0x2f9   :  { %1338 = vmatpush2.msra.mxu0 %v1212_v43 }
 0x2fa   :  { %1339 = vmatprep.subr.mxu0 %v1210_v45 }
 0x2fb   :  { %1340 = vmatpush2.msra.mxu0 %v1209_v46 }
 0x2fc   :  { %1341 = vmatprep.subr.mxu0 %v1207_v39 }
 0x2fd   :  { %1342 = vmatpush2.msra.mxu0 %v1206_v47 }
 0x2fe   :  { %1343 = vmatprep.subr.mxu0 %v1204_v48 }
 0x2ff   :  { %1344 = vmatpush2.msra.mxu0 %v1203_v50 }
 0x300   :  { %1345 = vmatprep.subr.mxu0 %v1201_v0 }
 0x301   :  { %1346 = vmatpush2.msra.mxu0 %v1200_v52 }
 0x302   :  { %1347 = vmatprep.subr.mxu0 %v1198_v1 }
 0x303   :  { %1348 = vmatpush2.msra.mxu0 %v1197_v53 }
 0x304   :  { %1349 = vmatprep.subr.mxu0 %v1195_v41 }
 0x305   :  { %1350 = vmatpush2.msra.mxu0 %v1194_v56 }
 0x306   :  { %1351 = vmatprep.subr.mxu0 %v1192_v57 }
 0x307   :  { %1352 = vmatpush2.msra.mxu0 %v1191_v58 }
 0x308   :  { %1353 = vmatprep.subr.mxu0 %v1189_v59 }
 0x309   :  { %1354 = vmatpush2.msra.mxu0 %v1188_v60 }
 0x30a   :  { %1355 = vmatprep.subr.mxu0 %v1186_v61 }
 0x30b   :  { %1356 = vmatpush2.msra.mxu0 %v1185_v62 }
 0x30c   :  { %1357 = vmatprep.subr.mxu0 %v1183_v3 }
 0x30d   :  { %1358 = vmatpush2.msra.mxu0 %v1182_v4 }
 0x30e   :  { %1836 = vmatprep.subr.mxu0 %v2244_v42 }
 0x343   :  { %v866_v35 = vpop.f32.mrf.mxu1 }
 0x344   :  { %v867_v45 = vadd.f32 %v866_v35, %v788_v38  ;;  %v1250_v35 = vld [vmem:[#allocation10 + $0x3a0] sm:$0xff] }
 0x345   :  { %v868_v37 = vpop.f32.mrf.mxu1 }
 0x346   :  { %v869_v39 = vadd.f32 %v868_v37, %v792_v40  ;;  %v1247_v37 = vld [vmem:[#allocation10 + $0x388] sm:$0xff] }
 0x347   :  { %v872_v43 = vpop.f32.mrf.mxu1 }
 0x348   :  { %v873_v0 = vadd.f32 %v872_v43, %v788_v38  ;;  %v1241_v43 = vld [vmem:[#allocation10 + $0x358] sm:$0xff] }
 0x349   :  { %v874_v48 = vpop.f32.mrf.mxu1 }
 0x34a   :  { %v875_v41 = vadd.f32 %v874_v48, %v792_v40  ;;  %v1244_v40 = vld [vmem:[#allocation10 + $0x370] sm:$0xff] }
 0x36e   :  { %v943_v46 = vpop.f32.mrf.mxu0 }
 0x36f   :  { %v944_v47 = vadd.f32 %v943_v46, %v867_v45  ;;  %v1238_v45 = vld [vmem:[#allocation10 + $0x340] sm:$0xff]  ;;  %v1235_v46 = vld [vmem:[#allocation10 + $0x328] sm:$0xff] }
 0x370   :  { %v945_v50 = vpop.f32.mrf.mxu0 }
 0x371   :  { %v1110_v52 = vmul.f32 0.70710677, %v944_v47  ;;  %v946_v1 = vadd.f32 %v945_v50, %v869_v39  ;;  %v1104_v6 = vmul.f32 0.5, %v944_v47  ;;  %v1232_v39 = vld [vmem:[#allocation10 + $0x310] sm:$0xff] }
 0x372   :  { %v949_v53 = vpop.f32.mrf.mxu0 }
 0x373   :  { %1909 = verf.f32 %v1110_v52  ;;  %v1111_v56 = vmul.f32 0.70710677, %v946_v1  ;;  %v950_v57 = vadd.f32 %v949_v53, %v873_v0  ;;  %v1105_v3 = vmul.f32 0.5, %v946_v1  ;;  %v1181_v52 = vld [vmem:[#allocation10 + $0x178] sm:$0xff]  ;;  %v1226_v53 = vld [vmem:[#allocation10 + $0x2e0] sm:$0xff] }
 0x374   :  { %v951_v58 = vpop.f32.mrf.mxu0 }
 0x375   :  { %1911 = verf.f32 %v1111_v56  ;;  %v1113_v59 = vmul.f32 0.70710677, %v950_v57  ;;  %v952_v60 = vadd.f32 %v951_v58, %v875_v41  ;;  %v1107_v51 = vmul.f32 0.5, %v950_v57  ;;  %v1178_v41 = vld [vmem:[#allocation10 + $0x160] sm:$0xff]  ;;  %v1223_v58 = vld [vmem:[#allocation10 + $0x2c8] sm:$0xff] }
 0x377   :  { %1913 = verf.f32 %v1113_v59  ;;  %v1114_v61 = vmul.f32 0.70710677, %v952_v60  ;;  %v1108_v10 = vmul.f32 0.5, %v952_v60  ;;  %v1175_v60 = vld [vmem:[#allocation10 + $0x148] sm:$0xff] }
 0x379   :  { %1915 = verf.f32 %v1114_v61  ;;  %v1220_v61 = vld [vmem:[#allocation10 + $0x2b0] sm:$0xff] }
 0x380   :  { %v1910_v62 = vpop.eup %1909 }
 0x381   :  { %v1122_v2 = vadd.f32 1.0, %v1910_v62  ;;  %v1172_v62 = vld [vmem:[#allocation10 + $0x130] sm:$0xff] }
 0x382   :  { %v1912_v63 = vpop.eup %1911 }
 0x383   :  { %v1123_v4 = vadd.f32 1.0, %v1912_v63  ;;  %v2254_v12 = vmul.f32 %v1122_v2, %v1104_v6  ;;  %v1217_v63 = vld [vmem:[#allocation10 + $0x298] sm:$0xff]  ;;  %v1208_v6 = vld [vmem:[#allocation10 + $0x250] sm:$0xff] }
 0x384   :  { %v1914_v5 = vpop.eup %1913  ;;  %v1169_v2 = vld [vmem:[#allocation10 + $0x118] sm:$0xff] }
 0x385   :  { %v2252_v7 = vmul.f32 %v1123_v4, %v1105_v3  ;;  %v1125_v49 = vadd.f32 1.0, %v1914_v5  ;;  %v1214_v3 = vld [vmem:[#allocation10 + $0x280] sm:$0xff]  ;;  %v1211_v4 = vld [vmem:[#allocation10 + $0x268] sm:$0xff] }
 0x386   :  { %v1916_v8 = vpop.eup %1915  ;;  %v1163_v5 = vld [vmem:[#allocation10 + $0xe8] sm:$0xff] }
 0x387   :  { %1359 = vmatprep.mubr.f32.mxu0 %v2252_v7  ;;  %v1126_v14 = vadd.f32 1.0, %v1916_v8  ;;  %v2261_v16 = vmul.f32 %v1125_v49, %v1107_v51  ;;  %v1160_v8 = vld [vmem:[#allocation10 + $0xd0] sm:$0xff]  ;;  %v1205_v49 = vld [vmem:[#allocation10 + $0x238] sm:$0xff]  ;;  %v1151_v51 = vld [vmem:[#allocation10 + $0x88] sm:$0xff] }
 0x388   :  { %1360 = vmatmul.mubr.f32.vlgmr.msra.gmra.mxu0 %v2254_v12 }
 0x389   :  { %v2258_v15 = vmul.f32 %v1126_v14, %v1108_v10  ;;  %1837 = vmatpush3.msra.mxu0 %v2244_v42  ;;  %v1835_v42 = vpop.f32.mrf.mxu1  ;;  %v1157_v10 = vld [vmem:[#allocation10 + $0xb8] sm:$0xff]  ;;  %v1202_v14 = vld [vmem:[#allocation10 + $0x220] sm:$0xff] }
 0x38a   :  { %1838 = vmatprep.subr.mxu0 %v1274_v54 }
 0x38b   :  { %1365 = vmatprep.mubr.f32.mxu0 %v2258_v15  ;;  %1839 = vmatpush3.msra.mxu0 %v1274_v54  ;;  %v1095_v28 = vpop.f32.mrf.mxu1  ;;  %v1199_v54 = vld [vmem:[#allocation10 + $0x208] sm:$0xff] }
 0x38c   :  { %1366 = vmatmul.mubr.f32.gmra.mxu0 %v2261_v16  ;;  %1840 = vmatprep.subr.mxu0 %v1271_v44 }
 0x38d   :  { %1841 = vmatpush3.msra.mxu0 %v1271_v44  ;;  %v1196_v44 = vld [vmem:[#allocation10 + $0x1f0] sm:$0xff] }
 0x38e   :  { %v1710_v19 = vpop.f32.mrf.mxu0  ;;  %1842 = vmatprep.subr.mxu0 %v1268_v17 }
 0x38f   :  { %1843 = vmatpush3.msra.mxu0 %v1268_v17  ;;  %v1148_v17 = vld [vmem:[#allocation10 + $0x70] sm:$0xff] }
 0x390   :  { %v1711_v22 = vpop.f32.mrf.mxu0  ;;  %1844 = vmatprep.subr.mxu0 %v1265_v18 }
 0x391   :  { %v1712_v23 = vadd.f32 %v1711_v22, %v1710_v19  ;;  %1845 = vmatpush3.msra.mxu0 %v1265_v18  ;;  %v1193_v18 = vld [vmem:[#allocation10 + $0x1d8] sm:$0xff]  ;;  %v1139_v22 = vld [vmem:[#allocation10 + $0x28] sm:$0xff] }
 0x392   :  { %v1713_v25 = vpop.f32.mrf.mxu0  ;;  %1846 = vmatprep.subr.mxu0 %v1262_v21  ;;  %v1145_v19 = vld [vmem:[#allocation10 + $0x58] sm:$0xff] }
 0x393   :  { %v1021_v26 = vadd.f32 %v1712_v23, %v796_v20  ;;  %1847 = vmatpush3.msra.mxu0 %v1262_v21  ;;  %v1142_v21 = vld [vmem:[#allocation10 + $0x40] sm:$0xff]  ;;  %v1184_v23 = vld [vmem:[#allocation10 + $0x190] sm:$0xff] }
 0x394   :  { %v1714_v29 = vpop.f32.mrf.mxu0  ;;  %1848 = vmatprep.subr.mxu0 %v1259_v24 }
 0x395   :  { %v1096_v30 = vadd.f32 %v1095_v28, %v1021_v26  ;;  %v1715_v31 = vadd.f32 %v1714_v29, %v1713_v25  ;;  %1849 = vmatpush3.msra.mxu0 %v1259_v24  ;;  %v1136_v24 = vld [vmem:[#allocation10 + $0x10] sm:$0xff]  ;;  %v1278_v26 = vld [vmem:[%s2291_s8] sm:$0x7]  ;;  %s2062_s8 = smov [#allocation11]  }
 0x396   :  { %1850 = vmatprep.subr.mxu0 %v1256_v27  ;;  %v1283_v28 = vrot.slane %v1278_v26, %v2206_v9  ;;  %v1287_v29 = vrot.slane %v1278_v26, %v2214_v11  ;;  %v1291_v11 = vrot.slane %v1278_v26, %v2234_v55  ;;  %s1612_s15 = sshll.u32 %s2062_s8, 4  ;;  %s1613_s15 = int_to_ptr.vmem [resolvable:$true] %s1612_s15 }
 0x397   :  { %v1112_v33 = vmul.f32 0.70710677, %v1096_v30  ;;  %v1026_v34 = vadd.f32 %v1715_v31, %v796_v20  ;;  %1851 = vmatpush3.msra.mxu0 %v1256_v27  ;;  %v1106_v48 = vmul.f32 0.5, %v1096_v30  ;;  %v1190_v20 = vld [vmem:[#allocation10 + $0x1c0] sm:$0xff]  ;;  %s2021_s18 = scalar_lea.vmem %s1613_s15, 768  ;;  %p2026_p12 = scmp.lt.s32.totalorder %s1613_s15, %s1613_s15 }
 0x398   :  { %1852 = vmatprep.subr.mxu0 %v1253_v32  ;;  %p2022_p11 = scmp.ne.s32.totalorder %s1613_s15, %s2021_s18  ;;  %p2027_p13 = scmp.lt.s32.totalorder %s2021_s18, %s2021_s18 }
 0x399   :  { %1917 = verf.f32 %v1112_v33  ;;  %v1101_v36 = vadd.f32 %v1835_v42, %v1026_v34  ;;  %1853 = vmatpush3.msra.mxu0 %v1253_v32  ;;  %v1187_v42 = vld [vmem:[#allocation10 + $0x1a8] sm:$0xff] }
 0x39a   :  { %1854 = vmatprep.subr.mxu0 %v1250_v35  ;;  %p2028_p0 = por %p2027_p13, %p2026_p12 }
 0x39b   :  { %v1115_v38 = vmul.f32 0.70710677, %v1101_v36  ;;  %1855 = vmatpush3.msra.mxu0 %v1250_v35  ;;  %v1109_v56 = vmul.f32 0.5, %v1101_v36 }
 0x39c   :  { %1856 = vmatprep.subr.mxu0 %v1247_v37  ;;  %p2029_p1 = pnand %p2028_p0, %p2022_p11 }
 0x39d   :  { %1919 = verf.f32 %v1115_v38  ;;  %1857 = vmatpush3.msra.mxu0 %v1247_v37 }
 0x39e   :  { %1858 = vmatprep.subr.mxu0 %v1244_v40 }
 0x39f   :  { %1859 = vmatpush3.msra.mxu0 %v1244_v40 }
 0x3a0   :  { %1860 = vmatprep.subr.mxu0 %v1241_v43 }
 0x3a1   :  { %1861 = vmatpush3.msra.mxu0 %v1241_v43 }
 0x3a2   :  { %1862 = vmatprep.subr.mxu0 %v1238_v45 }
 0x3a3   :  { %1863 = vmatpush3.msra.mxu0 %v1238_v45 }
 0x3a4   :  { %1864 = vmatprep.subr.mxu0 %v1235_v46 }
 0x3a5   :  { %1865 = vmatpush3.msra.mxu0 %v1235_v46 }
 0x3a6   :  { %v1918_v47 = vpop.eup %1917  ;;  %1866 = vmatprep.subr.mxu0 %v1232_v39 }
 0x3a7   :  { %v1124_v50 = vadd.f32 1.0, %v1918_v47  ;;  %1867 = vmatpush3.msra.mxu0 %v1232_v39 }
 0x3a9   :  { %v1130_v0 = vmul.f32 %v1124_v50, %v1106_v48 }
 0x3aa   :  { %v1920_v1 = vpop.eup %1919 }
 0x3ab   :  { %1437 = vmatmul.mubr.f32.vlgmr.msra.gmra.mxu1 %v1130_v0  ;;  %1868 = vmatprep.mubr.f32.mxu0 %v1130_v0  ;;  %v1127_v57 = vadd.f32 1.0, %v1920_v1 }
 0x3ac   :  { %1735 = vmatpush3.msra.mxu1 %v1181_v52  ;;  %1442 = vmatprep.mubr.f32.mxu1 %v2059_v13  ;;  %v1166_v13 = vld [vmem:[#allocation10 + $0x100] sm:$0xff] }
 0x3ad   :  { %1736 = vmatprep.subr.mxu1 %v1226_v53  ;;  %v1133_v59 = vmul.f32 %v1127_v57, %v1109_v56 }
 0x3ae   :  { %1737 = vmatpush3.msra.mxu1 %v1178_v41 }
 0x3af   :  { %1738 = vmatprep.subr.mxu1 %v1223_v58  ;;  %1443 = vmatmul.mubr.f32.gmra.mxu1 %v1133_v59 }
 0x3b0   :  { %1739 = vmatpush3.msra.mxu1 %v1175_v60  ;;  %1869 = vmatmul.mubr.f32.vlgmr.msra.gmra.mxu0 %v1133_v59 }
 0x3b1   :  { %1740 = vmatprep.subr.mxu1 %v1220_v61  ;;  %1513 = vmatprep.mubr.f32.mxu1 %v2252_v7  ;;  %v1154_v7 = vld [vmem:[#allocation10 + $0xa0] sm:$0xff] }
 0x3b2   :  { %1741 = vmatpush3.msra.mxu1 %v1172_v62 }
 0x3b3   :  { %1742 = vmatprep.subr.mxu1 %v1217_v63 }
 0x3b4   :  { %1743 = vmatpush3.msra.mxu1 %v1169_v2 }
 0x3b5   :  { %1744 = vmatprep.subr.mxu1 %v1214_v3 }
 0x3b6   :  { %1745 = vmatpush3.msra.mxu1 %v1166_v13 }
 0x3b7   :  { %1746 = vmatprep.subr.mxu1 %v1211_v4 }
 0x3b8   :  { %1747 = vmatpush3.msra.mxu1 %v1163_v5 }
 0x3b9   :  { %1748 = vmatprep.subr.mxu1 %v1208_v6 }
 0x3ba   :  { %1749 = vmatpush3.msra.mxu1 %v1160_v8 }
 0x3bb   :  { %1750 = vmatprep.subr.mxu1 %v1205_v49 }
 0x3bc   :  { %1751 = vmatpush3.msra.mxu1 %v1157_v10 }
 0x3bd   :  { %1752 = vmatprep.subr.mxu1 %v1202_v14 }
 0x3be   :  { %1753 = vmatpush3.msra.mxu1 %v1154_v7 }
 0x3bf   :  { %1754 = vmatprep.subr.mxu1 %v1199_v54 }
 0x3c0   :  { %1755 = vmatpush3.msra.mxu1 %v1151_v51 }
 0x3c1   :  { %1756 = vmatprep.subr.mxu1 %v1196_v44 }
 0x3c2   :  { %1757 = vmatpush3.msra.mxu1 %v1148_v17 }
 0x3c3   :  { %1758 = vmatprep.subr.mxu1 %v1193_v18 }
 0x3c4   :  { %1759 = vmatpush3.msra.mxu1 %v1145_v19 }
 0x3c5   :  { %1760 = vmatprep.subr.mxu1 %v1190_v20 }
 0x3c6   :  { %1761 = vmatpush3.msra.mxu1 %v1142_v21 }
 0x3c7   :  { %1762 = vmatprep.subr.mxu1 %v1187_v42 }
 0x3c8   :  { %1763 = vmatpush3.msra.mxu1 %v1139_v22 }
 0x3c9   :  { %1764 = vmatprep.subr.mxu1 %v1184_v23 }
 0x3ca   :  { %1765 = vmatpush3.msra.mxu1 %v1136_v24 }
 0x3cb   :  { %1514 = vmatmul.mubr.f32.vlgmr.msra.gmra.mxu1 %v2254_v12 }
 0x3cc   :  { %1518 = vmatprep.mubr.f32.mxu1 %v2258_v15 }
 0x3cf   :  { %1519 = vmatmul.mubr.f32.gmra.mxu1 %v2261_v16 }
 0x448   :  { %v1361_v25 = vpop.f32.mrf.mxu0 }
 0x449   :  { %v1362_v31 = vadd.f32 %v1361_v25, %v1283_v28 }
 0x44a   :  { %v1363_v27 = vpop.f32.mrf.mxu0 }
 0x44b   :  { %v1364_v33 = vadd.f32 %v1363_v27, %v1287_v29 }
 0x44c   :  { %v1367_v30 = vpop.f32.mrf.mxu0 }
 0x44d   :  { %v1368_v15 = vadd.f32 %v1367_v30, %v1283_v28 }
 0x44e   :  { %v1369_v12 = vpop.f32.mrf.mxu0 }
 0x44f   :  { %v1370_v37 = vadd.f32 %v1369_v12, %v1287_v29 }
 0x46b   :  { %v1438_v32 = vpop.f32.mrf.mxu1 }
 0x46c   :  { %v1439_v34 = vadd.f32 %v1438_v32, %v1362_v31 }
 0x46d   :  { %v1440_v35 = vpop.f32.mrf.mxu1 }
 0x46e   :  { %1599 = vst [vmem:[#allocation11] sm:$0xff] %v1439_v34  ;;  %v1441_v16 = vadd.f32 %v1440_v35, %v1364_v33 }
 0x46f   :  { %v1444_v36 = vpop.f32.mrf.mxu1 }
 0x470   :  { %1600 = vst [vmem:[#allocation11 + $0x8] sm:$0xff] %v1441_v16  ;;  %v1445_v38 = vadd.f32 %v1444_v36, %v1368_v15  ;;  %v1870_v45 = vpop.f32.mrf.mxu0 }
 0x471   :  { %v1446_v40 = vpop.f32.mrf.mxu1 }
 0x472   :  { %1602 = vst [vmem:[#allocation11 + $0x18] sm:$0xff] %v1445_v38  ;;  %v1447_v43 = vadd.f32 %v1446_v40, %v1370_v37  ;;  %v1590_v50 = vpop.f32.mrf.mxu0 }
 0x474   :  { %1603 = vst [vmem:[#allocation11 + $0x20] sm:$0xff] %v1447_v43 }
 0x48b   :  { %v1766_v9 = vpop.f32.mrf.mxu1 }
 0x48d   :  { %v1767_v46 = vpop.f32.mrf.mxu1 }
 0x48e   :  { %v1768_v39 = vadd.f32 %v1767_v46, %v1766_v9 }
 0x48f   :  { %v1769_v47 = vpop.f32.mrf.mxu1 }
 0x490   :  { %v1516_v48 = vadd.f32 %v1768_v39, %v1291_v11 }
 0x491   :  { %v1770_v0 = vpop.f32.mrf.mxu1 }
 0x492   :  { %v1591_v52 = vadd.f32 %v1590_v50, %v1516_v48  ;;  %v1771_v1 = vadd.f32 %v1770_v0, %v1769_v47 }
 0x494   :  { %1601 = vst [vmem:[#allocation11 + $0x10] sm:$0xff] %v1591_v52  ;;  %v1521_v53 = vadd.f32 %v1771_v1, %v1291_v11 }
 0x496   :  { %v1596_v41 = vadd.f32 %v1870_v45, %v1521_v53 }
 0x498   :  { %1604 = vst [vmem:[#allocation11 + $0x28] sm:$0xff] %v1596_v41 }
 0x499   :  { %2032 = shalt.err (!%p2029_p1)
}
 0x49a   :  { %1618 = dma.vmem_to_hbm [thread:$0]  %s1613_s15, 768, %s2293_s10, [#allocation4], %s2050_s16, %s2050_s16, %s2051_s17  }
 0x49b   :  { %2047 = dma.done.wait [#allocation4], 768  }
 0x49c   :  { %2048 = vsyncadd [#allocation4], 4294966528 }
 0x49d   :  { %1624 = vsyncpa [#allocation3], 1 }
 0x49e   :  { %1625 = vsyncpa [#allocation6], 1 }
 0x49f   :  { %1626 = vsyncpa [#allocation9], 1 }
 0x4a0   :  { %1627 = vsyncpa [#allocation4], 1 }

</bundles_post_ra>
